<compile_context>
chip_gen: v7x
topology: tpu7x:2x2x1
jax: 0.10.0
libtpu: 0.0.40
codegen_flags: <defaults>
</compile_context>

<pallas_src>
import jax
import jax.numpy as jnp
import numpy as np
from jax import lax
from jax.experimental import pallas as pl
from jax.experimental.pallas import tpu as pltpu

_VMEM = pl.BlockSpec(memory_space=pltpu.MemorySpace.VMEM)

# Static LeNet geometry (fc1 = 16*5*5 forces a 3x32x32 input).
_H = _W = 32
_CIN, _C1, _C2 = 3, 6, 16
_K = 5
_W1OUT = _W - _K + 1                 # 28  conv1 output cols
_W2OUT = (_W1OUT // 2) - _K + 1      # 10  conv2 output cols
_HP2 = 5                             # pooled conv2 spatial extent
_L0 = _W * _CIN                      # 96   input lanes   (w*3  + ci)
_L1 = _W1OUT * _C1                   # 168  conv1 lanes   (j*6  + co)
_L1P = _L1 - _C1                     # 162  pooled1 lanes (12*jp + c, c<6 valid)
_L2 = _W2OUT * _C2                   # 160  conv2 lanes   (16*j2 + co)
_L2P = _L2 - _C2                     # 144  pooled2 lanes (32*jp2 + co, co<16 valid)
_NCLS = 10


# ------------------------------ fused kernel --------------------------------


def _lenet_kernel(x_ref, w1_ref, b1_ref, w2_ref, b2_ref,
                  wf1_ref, bf1_ref, wf2_ref, bf2_ref, wf3_ref, bf3_ref,
                  o_ref):
    B = o_ref.shape[0]
    R1 = B * _H - 4            # conv1 rows: valid at b*32 + i,    i  < 28
    R2 = B * _H - 13           # conv2 rows: valid at b*32 + 2*i2, i2 < 10
    R3 = B * _H - 31           # fc rows:    valid at b*32

    # ---- conv1 + bias + ReLU: 5 banded matmuls over row-shifted slices ----
    a1 = jnp.dot(x_ref[pl.ds(0, R1), :].astype(jnp.bfloat16), w1_ref[0],
                 preferred_element_type=jnp.float32)
    for ki in range(1, _K):
        a1 += jnp.dot(x_ref[pl.ds(ki, R1), :].astype(jnp.bfloat16), w1_ref[ki],
                      preferred_element_type=jnp.float32)
    a1 = jnp.maximum(a1 + b1_ref[...], 0.0)                    # (R1, 168) f32

    # ---- 2x2 maxpool #1: row pair (h, h+1), then lane pair (j, j+1) -------
    p1 = jnp.maximum(a1[:R1 - 1, :], a1[1:, :])
    p1 = jnp.maximum(p1[:, :_L1P], p1[:, _C1:])                # (R1-1, 162)

    # ---- conv2 + bias + ReLU ----------------------------------------------
    a2 = jnp.dot(p1[0:R2, :].astype(jnp.bfloat16), w2_ref[0],
                 preferred_element_type=jnp.float32)
    for ki in range(1, _K):
        a2 += jnp.dot(p1[2 * ki:2 * ki + R2, :].astype(jnp.bfloat16),
                      w2_ref[ki], preferred_element_type=jnp.float32)
    a2 = jnp.maximum(a2 + b2_ref[...], 0.0)                    # (R2, 160) f32

    # ---- 2x2 maxpool #2: row pair (r, r+2), then lane pair (l, l+16) ------
    p2 = jnp.maximum(a2[:R2 - 2, :], a2[2:, :])
    p2 = jnp.maximum(p2[:, :_L2P], p2[:, _C2:])                # (R2-2, 144)

    # ---- fc1 (NCHW flatten folded into selection weights) + ReLU ----------
    h = jnp.dot(p2[0:R3, :].astype(jnp.bfloat16), wf1_ref[0],
                preferred_element_type=jnp.float32)
    for ip2 in range(1, _HP2):
        h += jnp.dot(p2[4 * ip2:4 * ip2 + R3, :].astype(jnp.bfloat16),
                     wf1_ref[ip2], preferred_element_type=jnp.float32)
    h = jnp.maximum(h + bf1_ref[...], 0.0)                     # (R3, 120)

    # ---- fc2 + ReLU, fc3 ----------------------------------------------------
    h = jnp.maximum(
        jnp.dot(h.astype(jnp.bfloat16), wf2_ref[...],
                preferred_element_type=jnp.float32) + bf2_ref[...], 0.0)
    y = jnp.dot(h.astype(jnp.bfloat16), wf3_ref[...],
                preferred_element_type=jnp.float32) + bf3_ref[...]  # (R3, 10)

    # Valid logits live at rows b*32; write them to the dense (B, 10) output.
    for b in range(B):
        o_ref[pl.ds(b, 1), :] = y[_H * b:_H * b + 1, :]


def lenet_forward(x_nchw, kp):
    """Full LeNet forward in a single pallas_call.  kp = prepare_params(...)."""
    B, C, H, W = x_nchw.shape
    assert (C, H, W) == (_CIN, _H, _W), "LeNet's fc1 forces a 3x32x32 input"
    # Only per-forward XLA work: NCHW -> (B*32, 96) slab (rows=(b,h), lanes=(w,c)).
    x2d = jnp.transpose(x_nchw, (0, 2, 3, 1)).reshape(B * _H, _L0)
    return pl.pallas_call(
        _lenet_kernel,
        out_shape=jax.ShapeDtypeStruct((B, _NCLS), jnp.float32),
        in_specs=[_VMEM] * 11,
        out_specs=_VMEM,
    )(x2d, kp["w1_band"], kp["b1_row"], kp["w2_band"], kp["b2_row"],
      kp["fc1_sel"], kp["fc1_b_row"], kp["fc2_w"], kp["fc2_b_row"],
      kp["fc3_w"], kp["fc3_b_row"])


# ------------------- init-time parameter pre-baking -------------------------


def _conv1_band(w_hwio):
    """(5,5,3,6) HWIO -> (5, 96, 168) bf16 banded matrices, one per kernel row.

    band[ki][w_in*3 + ci, j*6 + co] = w[ki, w_in - j, ci, co] for 0 <= w_in-j < 5.
    """
    shape = (_W1OUT, _K, _CIN, _C1)
    j = np.arange(_W1OUT)[:, None, None, None]
    kj = np.arange(_K)[None, :, None, None]
    ci = np.arange(_CIN)[None, None, :, None]
    co = np.arange(_C1)[None, None, None, :]
    rows = np.broadcast_to((j + kj) * _CIN + ci, shape).ravel()
    cols = np.broadcast_to(j * _C1 + co, shape).ravel()
    bands = []
    for ki in range(_K):
        vals = jnp.broadcast_to(w_hwio[ki], shape).reshape(-1)
        bands.append(jnp.zeros((_L0, _L1), jnp.float32).at[rows, cols].set(vals))
    return jnp.stack(bands).astype(jnp.bfloat16)


def _conv2_band(w_hwio):
    """(5,5,6,16) HWIO -> (5, 162, 160) bf16 banded matrices.

    band[ki][12*jp + c, 16*j2 + co] = w[ki, jp - j2, c, co] for 0 <= jp-j2 < 5.
    Lanes of the pooled-conv1 slab with c >= 6 are pool junk -> weight 0.
    """
    shape = (_W2OUT, _K, _C1, _C2)
    j2 = np.arange(_W2OUT)[:, None, None, None]
    kj = np.arange(_K)[None, :, None, None]
    c = np.arange(_C1)[None, None, :, None]
    co = np.arange(_C2)[None, None, None, :]
    rows = np.broadcast_to(2 * _C1 * (j2 + kj) + c, shape).ravel()
    cols = np.broadcast_to(_C2 * j2 + co, shape).ravel()
    bands = []
    for ki in range(_K):
        vals = jnp.broadcast_to(w_hwio[ki], shape).reshape(-1)
        bands.append(jnp.zeros((_L1P, _L2), jnp.float32).at[rows, cols].set(vals))
    return jnp.stack(bands).astype(jnp.bfloat16)


def _fc1_select(w_in_out):
    """(400,120) -> (5, 144, 120) bf16 selection matrices, one per pooled row ip2.

    sel[ip2][32*jp2 + co, n] = w[co*25 + ip2*5 + jp2, n]  (torch NCHW flatten).
    Lanes of the pooled-conv2 slab with co >= 16 are pool junk -> weight 0.
    """
    n_out = w_in_out.shape[1]
    jp2 = np.arange(_HP2)[:, None]
    co = np.arange(_C2)[None, :]
    rows = (2 * _C2 * jp2 + co).ravel()
    sel = []
    for ip2 in range(_HP2):
        feat = (co * (_HP2 * _HP2) + ip2 * _HP2 + jp2).ravel()
        m = jnp.zeros((_L2P, n_out), jnp.float32).at[rows].set(w_in_out[feat, :])
        sel.append(m)
    return jnp.stack(sel).astype(jnp.bfloat16)


def prepare_params(p):
    """Pre-bake parameters into kernel-native layouts (run once at init)."""
    return {
        "w1_band": _conv1_band(p["conv1_w"]),
        "b1_row": jnp.tile(p["conv1_b"], _W1OUT)[None, :].astype(jnp.float32),
        "w2_band": _conv2_band(p["conv2_w"]),
        "b2_row": jnp.tile(p["conv2_b"], _W2OUT)[None, :].astype(jnp.float32),
        "fc1_sel": _fc1_select(p["fc1_w"]),
        "fc1_b_row": p["fc1_b"][None, :].astype(jnp.float32),
        "fc2_w": p["fc2_w"].astype(jnp.bfloat16),
        "fc2_b_row": p["fc2_b"][None, :].astype(jnp.float32),
        "fc3_w": p["fc3_w"].astype(jnp.bfloat16),
        "fc3_b_row": p["fc3_b"][None, :].astype(jnp.float32),
    }


# ----------------------------- params & reference ---------------------------


def init_params(key):
    """Reference-layout parameters: conv HWIO, fc (in, out)."""
    ks = jax.random.split(key, 10)
    s = 0.1
    return {
        "conv1_w": jax.random.normal(ks[0], (5, 5, 3, 6), jnp.float32) * s,
        "conv1_b": jax.random.normal(ks[1], (6,), jnp.float32) * s,
        "conv2_w": jax.random.normal(ks[2], (5, 5, 6, 16), jnp.float32) * s,
        "conv2_b": jax.random.normal(ks[3], (16,), jnp.float32) * s,
        "fc1_w": jax.random.normal(ks[4], (400, 120), jnp.float32) * s,
        "fc1_b": jax.random.normal(ks[5], (120,), jnp.float32) * s,
        "fc2_w": jax.random.normal(ks[6], (120, 84), jnp.float32) * s,
        "fc2_b": jax.random.normal(ks[7], (84,), jnp.float32) * s,
        "fc3_w": jax.random.normal(ks[8], (84, 10), jnp.float32) * s,
        "fc3_b": jax.random.normal(ks[9], (10,), jnp.float32) * s,
    }


def lenet_reference(x_nchw, p):
    """Pure-JAX f32 reference mirroring the PyTorch module exactly."""
    dn = ("NCHW", "HWIO", "NCHW")
    y = lax.conv_general_dilated(x_nchw, p["conv1_w"], (1, 1), "VALID",
                                 dimension_numbers=dn)
    y = jnp.maximum(y + p["conv1_b"][None, :, None, None], 0.0)
    y = lax.reduce_window(y, -jnp.inf, lax.max, (1, 1, 2, 2), (1, 1, 2, 2),
                          "VALID")
    y = lax.conv_general_dilated(y, p["conv2_w"], (1, 1), "VALID",
                                 dimension_numbers=dn)
    y = jnp.maximum(y + p["conv2_b"][None, :, None, None], 0.0)
    y = lax.reduce_window(y, -jnp.inf, lax.max, (1, 1, 2, 2), (1, 1, 2, 2),
                          "VALID")
    y = y.reshape(y.shape[0], -1)
    y = jnp.maximum(y @ p["fc1_w"] + p["fc1_b"], 0.0)
    y = jnp.maximum(y @ p["fc2_w"] + p["fc2_b"], 0.0)
    return y @ p["fc3_w"] + p["fc3_b"]


if __name__ == "__main__":
    key = jax.random.PRNGKey(0)
    kx, kw = jax.random.split(key)
    # LeNet's fc1 (16*5*5) forces 32x32 spatial input with 3 channels.
    x = jax.random.normal(kx, (2, 3, 32, 32), jnp.float32)
    params = init_params(kw)
    kparams = prepare_params(params)          # init-time pre-baking, once

    out = jax.block_until_ready(jax.jit(lenet_forward)(x, kparams))
    assert out.shape == (2, 10), out.shape

    ref = jax.block_until_ready(lenet_reference(x, params))
    np.testing.assert_allclose(np.asarray(out), np.asarray(ref),
                               rtol=2e-2, atol=2e-2)
    print("KERNEL_OK")
</pallas_src>

<mosaic_0001>
module attributes {stable_mosaic.version = 11 : i64} {
  func.func @_lenet_kernel(%arg0: memref<64x96xf32, #tpu.memory_space<vmem>>, %arg1: memref<5x96x168xbf16, #tpu.memory_space<vmem>>, %arg2: memref<1x168xf32, #tpu.memory_space<vmem>>, %arg3: memref<5x162x160xbf16, #tpu.memory_space<vmem>>, %arg4: memref<1x160xf32, #tpu.memory_space<vmem>>, %arg5: memref<5x144x120xbf16, #tpu.memory_space<vmem>>, %arg6: memref<1x120xf32, #tpu.memory_space<vmem>>, %arg7: memref<120x84xbf16, #tpu.memory_space<vmem>>, %arg8: memref<1x84xf32, #tpu.memory_space<vmem>>, %arg9: memref<84x10xbf16, #tpu.memory_space<vmem>>, %arg10: memref<1x10xf32, #tpu.memory_space<vmem>>, %arg11: memref<2x10xf32, #tpu.memory_space<vmem>>) attributes {dimension_semantics = [], scalar_prefetch = 0 : i64, scratch_operands = 0 : i64, tpu.core_type = #tpu.core_type<tc>} {
    %c0 = arith.constant 0 : index
    %c0_0 = arith.constant 0 : index
    %0 = vector.load %arg0[%c0, %c0_0] : memref<64x96xf32, #tpu.memory_space<vmem>>, vector<60x96xf32>
    %1 = arith.truncf %0 : vector<60x96xf32> to vector<60x96xbf16>
    %c0_1 = arith.constant 0 : index
    %c0_2 = arith.constant 0 : index
    %c0_3 = arith.constant 0 : index
    %2 = vector.load %arg1[%c0_1, %c0_2, %c0_3] : memref<5x96x168xbf16, #tpu.memory_space<vmem>>, vector<1x96x168xbf16>
    %3 = vector.shape_cast %2 : vector<1x96x168xbf16> to vector<96x168xbf16>
    %cst = arith.constant dense<0.000000e+00> : vector<60x168xf32>
    %4 = tpu.matmul %1, %3, %cst {dimension_numbers = #tpu.dot_dimension_numbers<[1], [0], [0], [1], [0, 0, 1, 1], [], []>} : vector<60x96xbf16>, vector<96x168xbf16>, vector<60x168xf32> -> vector<60x168xf32>
    %c1 = arith.constant 1 : index
    %c0_4 = arith.constant 0 : index
    %5 = vector.load %arg0[%c1, %c0_4] : memref<64x96xf32, #tpu.memory_space<vmem>>, vector<60x96xf32>
    %6 = arith.truncf %5 : vector<60x96xf32> to vector<60x96xbf16>
    %c1_5 = arith.constant 1 : index
    %c0_6 = arith.constant 0 : index
    %c0_7 = arith.constant 0 : index
    %7 = vector.load %arg1[%c1_5, %c0_6, %c0_7] : memref<5x96x168xbf16, #tpu.memory_space<vmem>>, vector<1x96x168xbf16>
    %8 = vector.shape_cast %7 : vector<1x96x168xbf16> to vector<96x168xbf16>
    %cst_8 = arith.constant dense<0.000000e+00> : vector<60x168xf32>
    %9 = tpu.matmul %6, %8, %cst_8 {dimension_numbers = #tpu.dot_dimension_numbers<[1], [0], [0], [1], [0, 0, 1, 1], [], []>} : vector<60x96xbf16>, vector<96x168xbf16>, vector<60x168xf32> -> vector<60x168xf32>
    %10 = arith.addf %4, %9 : vector<60x168xf32>
    %c2 = arith.constant 2 : index
    %c0_9 = arith.constant 0 : index
    %11 = vector.load %arg0[%c2, %c0_9] : memref<64x96xf32, #tpu.memory_space<vmem>>, vector<60x96xf32>
    %12 = arith.truncf %11 : vector<60x96xf32> to vector<60x96xbf16>
    %c2_10 = arith.constant 2 : index
    %c0_11 = arith.constant 0 : index
    %c0_12 = arith.constant 0 : index
    %13 = vector.load %arg1[%c2_10, %c0_11, %c0_12] : memref<5x96x168xbf16, #tpu.memory_space<vmem>>, vector<1x96x168xbf16>
    %14 = vector.shape_cast %13 : vector<1x96x168xbf16> to vector<96x168xbf16>
    %cst_13 = arith.constant dense<0.000000e+00> : vector<60x168xf32>
    %15 = tpu.matmul %12, %14, %cst_13 {dimension_numbers = #tpu.dot_dimension_numbers<[1], [0], [0], [1], [0, 0, 1, 1], [], []>} : vector<60x96xbf16>, vector<96x168xbf16>, vector<60x168xf32> -> vector<60x168xf32>
    %16 = arith.addf %10, %15 : vector<60x168xf32>
    %c3 = arith.constant 3 : index
    %c0_14 = arith.constant 0 : index
    %17 = vector.load %arg0[%c3, %c0_14] : memref<64x96xf32, #tpu.memory_space<vmem>>, vector<60x96xf32>
    %18 = arith.truncf %17 : vector<60x96xf32> to vector<60x96xbf16>
    %c3_15 = arith.constant 3 : index
    %c0_16 = arith.constant 0 : index
    %c0_17 = arith.constant 0 : index
    %19 = vector.load %arg1[%c3_15, %c0_16, %c0_17] : memref<5x96x168xbf16, #tpu.memory_space<vmem>>, vector<1x96x168xbf16>
    %20 = vector.shape_cast %19 : vector<1x96x168xbf16> to vector<96x168xbf16>
    %cst_18 = arith.constant dense<0.000000e+00> : vector<60x168xf32>
    %21 = tpu.matmul %18, %20, %cst_18 {dimension_numbers = #tpu.dot_dimension_numbers<[1], [0], [0], [1], [0, 0, 1, 1], [], []>} : vector<60x96xbf16>, vector<96x168xbf16>, vector<60x168xf32> -> vector<60x168xf32>
    %22 = arith.addf %16, %21 : vector<60x168xf32>
    %c4 = arith.constant 4 : index
    %c0_19 = arith.constant 0 : index
    %23 = vector.load %arg0[%c4, %c0_19] : memref<64x96xf32, #tpu.memory_space<vmem>>, vector<60x96xf32>
    %24 = arith.truncf %23 : vector<60x96xf32> to vector<60x96xbf16>
    %c4_20 = arith.constant 4 : index
    %c0_21 = arith.constant 0 : index
    %c0_22 = arith.constant 0 : index
    %25 = vector.load %arg1[%c4_20, %c0_21, %c0_22] : memref<5x96x168xbf16, #tpu.memory_space<vmem>>, vector<1x96x168xbf16>
    %26 = vector.shape_cast %25 : vector<1x96x168xbf16> to vector<96x168xbf16>
    %cst_23 = arith.constant dense<0.000000e+00> : vector<60x168xf32>
    %27 = tpu.matmul %24, %26, %cst_23 {dimension_numbers = #tpu.dot_dimension_numbers<[1], [0], [0], [1], [0, 0, 1, 1], [], []>} : vector<60x96xbf16>, vector<96x168xbf16>, vector<60x168xf32> -> vector<60x168xf32>
    %28 = arith.addf %22, %27 : vector<60x168xf32>
    %c0_24 = arith.constant 0 : index
    %c0_25 = arith.constant 0 : index
    %29 = vector.load %arg2[%c0_24, %c0_25] : memref<1x168xf32, #tpu.memory_space<vmem>>, vector<1x168xf32>
    %30 = vector.broadcast %29 : vector<1x168xf32> to vector<60x168xf32>
    %31 = arith.addf %28, %30 : vector<60x168xf32>
    %cst_26 = arith.constant 0.000000e+00 : f32
    %32 = vector.broadcast %cst_26 : f32 to vector<60x168xf32>
    %33 = arith.maximumf %31, %32 : vector<60x168xf32>
    %34 = vector.extract_strided_slice %33 {offsets = [0, 0], sizes = [59, 168], strides = [1, 1]} : vector<60x168xf32> to vector<59x168xf32>
    %35 = vector.extract_strided_slice %33 {offsets = [1, 0], sizes = [59, 168], strides = [1, 1]} : vector<60x168xf32> to vector<59x168xf32>
    %36 = arith.maximumf %34, %35 : vector<59x168xf32>
    %37 = vector.extract_strided_slice %36 {offsets = [0, 0], sizes = [59, 162], strides = [1, 1]} : vector<59x168xf32> to vector<59x162xf32>
    %38 = vector.extract_strided_slice %36 {offsets = [0, 6], sizes = [59, 162], strides = [1, 1]} : vector<59x168xf32> to vector<59x162xf32>
    %39 = arith.maximumf %37, %38 : vector<59x162xf32>
    %40 = vector.extract_strided_slice %39 {offsets = [0, 0], sizes = [51, 162], strides = [1, 1]} : vector<59x162xf32> to vector<51x162xf32>
    %41 = arith.truncf %40 : vector<51x162xf32> to vector<51x162xbf16>
    %c0_27 = arith.constant 0 : index
    %c0_28 = arith.constant 0 : index
    %c0_29 = arith.constant 0 : index
    %42 = vector.load %arg3[%c0_27, %c0_28, %c0_29] : memref<5x162x160xbf16, #tpu.memory_space<vmem>>, vector<1x162x160xbf16>
    %43 = vector.shape_cast %42 : vector<1x162x160xbf16> to vector<162x160xbf16>
    %cst_30 = arith.constant dense<0.000000e+00> : vector<51x160xf32>
    %44 = tpu.matmul %41, %43, %cst_30 {dimension_numbers = #tpu.dot_dimension_numbers<[1], [0], [0], [1], [0, 0, 1, 1], [], []>} : vector<51x162xbf16>, vector<162x160xbf16>, vector<51x160xf32> -> vector<51x160xf32>
    %45 = vector.extract_strided_slice %39 {offsets = [2, 0], sizes = [51, 162], strides = [1, 1]} : vector<59x162xf32> to vector<51x162xf32>
    %46 = arith.truncf %45 : vector<51x162xf32> to vector<51x162xbf16>
    %c1_31 = arith.constant 1 : index
    %c0_32 = arith.constant 0 : index
    %c0_33 = arith.constant 0 : index
    %47 = vector.load %arg3[%c1_31, %c0_32, %c0_33] : memref<5x162x160xbf16, #tpu.memory_space<vmem>>, vector<1x162x160xbf16>
    %48 = vector.shape_cast %47 : vector<1x162x160xbf16> to vector<162x160xbf16>
    %cst_34 = arith.constant dense<0.000000e+00> : vector<51x160xf32>
    %49 = tpu.matmul %46, %48, %cst_34 {dimension_numbers = #tpu.dot_dimension_numbers<[1], [0], [0], [1], [0, 0, 1, 1], [], []>} : vector<51x162xbf16>, vector<162x160xbf16>, vector<51x160xf32> -> vector<51x160xf32>
    %50 = arith.addf %44, %49 : vector<51x160xf32>
    %51 = vector.extract_strided_slice %39 {offsets = [4, 0], sizes = [51, 162], strides = [1, 1]} : vector<59x162xf32> to vector<51x162xf32>
    %52 = arith.truncf %51 : vector<51x162xf32> to vector<51x162xbf16>
    %c2_35 = arith.constant 2 : index
    %c0_36 = arith.constant 0 : index
    %c0_37 = arith.constant 0 : index
    %53 = vector.load %arg3[%c2_35, %c0_36, %c0_37] : memref<5x162x160xbf16, #tpu.memory_space<vmem>>, vector<1x162x160xbf16>
    %54 = vector.shape_cast %53 : vector<1x162x160xbf16> to vector<162x160xbf16>
    %cst_38 = arith.constant dense<0.000000e+00> : vector<51x160xf32>
    %55 = tpu.matmul %52, %54, %cst_38 {dimension_numbers = #tpu.dot_dimension_numbers<[1], [0], [0], [1], [0, 0, 1, 1], [], []>} : vector<51x162xbf16>, vector<162x160xbf16>, vector<51x160xf32> -> vector<51x160xf32>
    %56 = arith.addf %50, %55 : vector<51x160xf32>
    %57 = vector.extract_strided_slice %39 {offsets = [6, 0], sizes = [51, 162], strides = [1, 1]} : vector<59x162xf32> to vector<51x162xf32>
    %58 = arith.truncf %57 : vector<51x162xf32> to vector<51x162xbf16>
    %c3_39 = arith.constant 3 : index
    %c0_40 = arith.constant 0 : index
    %c0_41 = arith.constant 0 : index
    %59 = vector.load %arg3[%c3_39, %c0_40, %c0_41] : memref<5x162x160xbf16, #tpu.memory_space<vmem>>, vector<1x162x160xbf16>
    %60 = vector.shape_cast %59 : vector<1x162x160xbf16> to vector<162x160xbf16>
    %cst_42 = arith.constant dense<0.000000e+00> : vector<51x160xf32>
    %61 = tpu.matmul %58, %60, %cst_42 {dimension_numbers = #tpu.dot_dimension_numbers<[1], [0], [0], [1], [0, 0, 1, 1], [], []>} : vector<51x162xbf16>, vector<162x160xbf16>, vector<51x160xf32> -> vector<51x160xf32>
    %62 = arith.addf %56, %61 : vector<51x160xf32>
    %63 = vector.extract_strided_slice %39 {offsets = [8, 0], sizes = [51, 162], strides = [1, 1]} : vector<59x162xf32> to vector<51x162xf32>
    %64 = arith.truncf %63 : vector<51x162xf32> to vector<51x162xbf16>
    %c4_43 = arith.constant 4 : index
    %c0_44 = arith.constant 0 : index
    %c0_45 = arith.constant 0 : index
    %65 = vector.load %arg3[%c4_43, %c0_44, %c0_45] : memref<5x162x160xbf16, #tpu.memory_space<vmem>>, vector<1x162x160xbf16>
    %66 = vector.shape_cast %65 : vector<1x162x160xbf16> to vector<162x160xbf16>
    %cst_46 = arith.constant dense<0.000000e+00> : vector<51x160xf32>
    %67 = tpu.matmul %64, %66, %cst_46 {dimension_numbers = #tpu.dot_dimension_numbers<[1], [0], [0], [1], [0, 0, 1, 1], [], []>} : vector<51x162xbf16>, vector<162x160xbf16>, vector<51x160xf32> -> vector<51x160xf32>
    %68 = arith.addf %62, %67 : vector<51x160xf32>
    %c0_47 = arith.constant 0 : index
    %c0_48 = arith.constant 0 : index
    %69 = vector.load %arg4[%c0_47, %c0_48] : memref<1x160xf32, #tpu.memory_space<vmem>>, vector<1x160xf32>
    %70 = vector.broadcast %69 : vector<1x160xf32> to vector<51x160xf32>
    %71 = arith.addf %68, %70 : vector<51x160xf32>
    %cst_49 = arith.constant 0.000000e+00 : f32
    %72 = vector.broadcast %cst_49 : f32 to vector<51x160xf32>
    %73 = arith.maximumf %71, %72 : vector<51x160xf32>
    %74 = vector.extract_strided_slice %73 {offsets = [0, 0], sizes = [49, 160], strides = [1, 1]} : vector<51x160xf32> to vector<49x160xf32>
    %75 = vector.extract_strided_slice %73 {offsets = [2, 0], sizes = [49, 160], strides = [1, 1]} : vector<51x160xf32> to vector<49x160xf32>
    %76 = arith.maximumf %74, %75 : vector<49x160xf32>
    %77 = vector.extract_strided_slice %76 {offsets = [0, 0], sizes = [49, 144], strides = [1, 1]} : vector<49x160xf32> to vector<49x144xf32>
    %78 = vector.extract_strided_slice %76 {offsets = [0, 16], sizes = [49, 144], strides = [1, 1]} : vector<49x160xf32> to vector<49x144xf32>
    %79 = arith.maximumf %77, %78 : vector<49x144xf32>
    %80 = vector.extract_strided_slice %79 {offsets = [0, 0], sizes = [33, 144], strides = [1, 1]} : vector<49x144xf32> to vector<33x144xf32>
    %81 = arith.truncf %80 : vector<33x144xf32> to vector<33x144xbf16>
    %c0_50 = arith.constant 0 : index
    %c0_51 = arith.constant 0 : index
    %c0_52 = arith.constant 0 : index
    %82 = vector.load %arg5[%c0_50, %c0_51, %c0_52] : memref<5x144x120xbf16, #tpu.memory_space<vmem>>, vector<1x144x120xbf16>
    %83 = vector.shape_cast %82 : vector<1x144x120xbf16> to vector<144x120xbf16>
    %cst_53 = arith.constant dense<0.000000e+00> : vector<33x120xf32>
    %84 = tpu.matmul %81, %83, %cst_53 {dimension_numbers = #tpu.dot_dimension_numbers<[1], [0], [0], [1], [0, 0, 1, 1], [], []>} : vector<33x144xbf16>, vector<144x120xbf16>, vector<33x120xf32> -> vector<33x120xf32>
    %85 = vector.extract_strided_slice %79 {offsets = [4, 0], sizes = [33, 144], strides = [1, 1]} : vector<49x144xf32> to vector<33x144xf32>
    %86 = arith.truncf %85 : vector<33x144xf32> to vector<33x144xbf16>
    %c1_54 = arith.constant 1 : index
    %c0_55 = arith.constant 0 : index
    %c0_56 = arith.constant 0 : index
    %87 = vector.load %arg5[%c1_54, %c0_55, %c0_56] : memref<5x144x120xbf16, #tpu.memory_space<vmem>>, vector<1x144x120xbf16>
    %88 = vector.shape_cast %87 : vector<1x144x120xbf16> to vector<144x120xbf16>
    %cst_57 = arith.constant dense<0.000000e+00> : vector<33x120xf32>
    %89 = tpu.matmul %86, %88, %cst_57 {dimension_numbers = #tpu.dot_dimension_numbers<[1], [0], [0], [1], [0, 0, 1, 1], [], []>} : vector<33x144xbf16>, vector<144x120xbf16>, vector<33x120xf32> -> vector<33x120xf32>
    %90 = arith.addf %84, %89 : vector<33x120xf32>
    %91 = vector.extract_strided_slice %79 {offsets = [8, 0], sizes = [33, 144], strides = [1, 1]} : vector<49x144xf32> to vector<33x144xf32>
    %92 = arith.truncf %91 : vector<33x144xf32> to vector<33x144xbf16>
    %c2_58 = arith.constant 2 : index
    %c0_59 = arith.constant 0 : index
    %c0_60 = arith.constant 0 : index
    %93 = vector.load %arg5[%c2_58, %c0_59, %c0_60] : memref<5x144x120xbf16, #tpu.memory_space<vmem>>, vector<1x144x120xbf16>
    %94 = vector.shape_cast %93 : vector<1x144x120xbf16> to vector<144x120xbf16>
    %cst_61 = arith.constant dense<0.000000e+00> : vector<33x120xf32>
    %95 = tpu.matmul %92, %94, %cst_61 {dimension_numbers = #tpu.dot_dimension_numbers<[1], [0], [0], [1], [0, 0, 1, 1], [], []>} : vector<33x144xbf16>, vector<144x120xbf16>, vector<33x120xf32> -> vector<33x120xf32>
    %96 = arith.addf %90, %95 : vector<33x120xf32>
    %97 = vector.extract_strided_slice %79 {offsets = [12, 0], sizes = [33, 144], strides = [1, 1]} : vector<49x144xf32> to vector<33x144xf32>
    %98 = arith.truncf %97 : vector<33x144xf32> to vector<33x144xbf16>
    %c3_62 = arith.constant 3 : index
    %c0_63 = arith.constant 0 : index
    %c0_64 = arith.constant 0 : index
    %99 = vector.load %arg5[%c3_62, %c0_63, %c0_64] : memref<5x144x120xbf16, #tpu.memory_space<vmem>>, vector<1x144x120xbf16>
    %100 = vector.shape_cast %99 : vector<1x144x120xbf16> to vector<144x120xbf16>
    %cst_65 = arith.constant dense<0.000000e+00> : vector<33x120xf32>
    %101 = tpu.matmul %98, %100, %cst_65 {dimension_numbers = #tpu.dot_dimension_numbers<[1], [0], [0], [1], [0, 0, 1, 1], [], []>} : vector<33x144xbf16>, vector<144x120xbf16>, vector<33x120xf32> -> vector<33x120xf32>
    %102 = arith.addf %96, %101 : vector<33x120xf32>
    %103 = vector.extract_strided_slice %79 {offsets = [16, 0], sizes = [33, 144], strides = [1, 1]} : vector<49x144xf32> to vector<33x144xf32>
    %104 = arith.truncf %103 : vector<33x144xf32> to vector<33x144xbf16>
    %c4_66 = arith.constant 4 : index
    %c0_67 = arith.constant 0 : index
    %c0_68 = arith.constant 0 : index
    %105 = vector.load %arg5[%c4_66, %c0_67, %c0_68] : memref<5x144x120xbf16, #tpu.memory_space<vmem>>, vector<1x144x120xbf16>
    %106 = vector.shape_cast %105 : vector<1x144x120xbf16> to vector<144x120xbf16>
    %cst_69 = arith.constant dense<0.000000e+00> : vector<33x120xf32>
    %107 = tpu.matmul %104, %106, %cst_69 {dimension_numbers = #tpu.dot_dimension_numbers<[1], [0], [0], [1], [0, 0, 1, 1], [], []>} : vector<33x144xbf16>, vector<144x120xbf16>, vector<33x120xf32> -> vector<33x120xf32>
    %108 = arith.addf %102, %107 : vector<33x120xf32>
    %c0_70 = arith.constant 0 : index
    %c0_71 = arith.constant 0 : index
    %109 = vector.load %arg6[%c0_70, %c0_71] : memref<1x120xf32, #tpu.memory_space<vmem>>, vector<1x120xf32>
    %110 = vector.broadcast %109 : vector<1x120xf32> to vector<33x120xf32>
    %111 = arith.addf %108, %110 : vector<33x120xf32>
    %cst_72 = arith.constant 0.000000e+00 : f32
    %112 = vector.broadcast %cst_72 : f32 to vector<33x120xf32>
    %113 = arith.maximumf %111, %112 : vector<33x120xf32>
    %114 = arith.truncf %113 : vector<33x120xf32> to vector<33x120xbf16>
    %c0_73 = arith.constant 0 : index
    %c0_74 = arith.constant 0 : index
    %115 = vector.load %arg7[%c0_73, %c0_74] : memref<120x84xbf16, #tpu.memory_space<vmem>>, vector<120x84xbf16>
    %cst_75 = arith.constant dense<0.000000e+00> : vector<33x84xf32>
    %116 = tpu.matmul %114, %115, %cst_75 {dimension_numbers = #tpu.dot_dimension_numbers<[1], [0], [0], [1], [0, 0, 1, 1], [], []>} : vector<33x120xbf16>, vector<120x84xbf16>, vector<33x84xf32> -> vector<33x84xf32>
    %c0_76 = arith.constant 0 : index
    %c0_77 = arith.constant 0 : index
    %117 = vector.load %arg8[%c0_76, %c0_77] : memref<1x84xf32, #tpu.memory_space<vmem>>, vector<1x84xf32>
    %118 = vector.broadcast %117 : vector<1x84xf32> to vector<33x84xf32>
    %119 = arith.addf %116, %118 : vector<33x84xf32>
    %cst_78 = arith.constant 0.000000e+00 : f32
    %120 = vector.broadcast %cst_78 : f32 to vector<33x84xf32>
    %121 = arith.maximumf %119, %120 : vector<33x84xf32>
    %122 = arith.truncf %121 : vector<33x84xf32> to vector<33x84xbf16>
    %c0_79 = arith.constant 0 : index
    %c0_80 = arith.constant 0 : index
    %123 = vector.load %arg9[%c0_79, %c0_80] : memref<84x10xbf16, #tpu.memory_space<vmem>>, vector<84x10xbf16>
    %cst_81 = arith.constant dense<0.000000e+00> : vector<33x10xf32>
    %124 = tpu.matmul %122, %123, %cst_81 {dimension_numbers = #tpu.dot_dimension_numbers<[1], [0], [0], [1], [0, 0, 1, 1], [], []>} : vector<33x84xbf16>, vector<84x10xbf16>, vector<33x10xf32> -> vector<33x10xf32>
    %c0_82 = arith.constant 0 : index
    %c0_83 = arith.constant 0 : index
    %125 = vector.load %arg10[%c0_82, %c0_83] : memref<1x10xf32, #tpu.memory_space<vmem>>, vector<1x10xf32>
    %126 = vector.broadcast %125 : vector<1x10xf32> to vector<33x10xf32>
    %127 = arith.addf %124, %126 : vector<33x10xf32>
    %128 = vector.extract_strided_slice %127 {offsets = [0, 0], sizes = [1, 10], strides = [1, 1]} : vector<33x10xf32> to vector<1x10xf32>
    %c0_84 = arith.constant 0 : index
    %c0_85 = arith.constant 0 : index
    %129 = vector.load %arg11[%c0_84, %c0_85] : memref<2x10xf32, #tpu.memory_space<vmem>>, vector<1x10xf32>
    tpu.vector_store %arg11[%c0_84, %c0_85], %128 {strides = array<i32>} : memref<2x10xf32, #tpu.memory_space<vmem>>, vector<1x10xf32>,
    %130 = vector.extract_strided_slice %127 {offsets = [32, 0], sizes = [1, 10], strides = [1, 1]} : vector<33x10xf32> to vector<1x10xf32>
    %c1_86 = arith.constant 1 : index
    %c0_87 = arith.constant 0 : index
    %131 = vector.load %arg11[%c1_86, %c0_87] : memref<2x10xf32, #tpu.memory_space<vmem>>, vector<1x10xf32>
    tpu.vector_store %arg11[%c1_86, %c0_87], %130 {strides = array<i32>} : memref<2x10xf32, #tpu.memory_space<vmem>>, vector<1x10xf32>,
    return
  }
}

</mosaic_0001>

<bundles_post_ra>
// kernel: lenet_forward.1
= control target key start
LH: loop header
LB: loop body
LE: loop exit
PB: predicated region body
PF: predicated region fallthrough
CT: control target
= control target key end

     0   :  { %v4713_v2 = vmov 0   ;;  %vm149_vm0 = vcmask 785408   ;;  %s6289_s0 = inlined_call_operand.vmem [shape: f32[64,96], index: 0, kind: input, shape index: {}]   ;;  %s6290_s1 = inlined_call_operand.vmem [shape: bf16[5,96,168], index: 1, kind: input, shape index: {}]   ;;  %s6291_s2 = inlined_call_operand.vmem [shape: f32[1,168], index: 2, kind: input, shape index: {}]   ;;  %s6292_s3 = inlined_call_operand.vmem [shape: bf16[5,162,160], index: 3, kind: input, shape index: {}]   ;;  %s6293_s4 = inlined_call_operand.vmem [shape: f32[1,160], index: 4, kind: input, shape index: {}]   ;;  %s6294_s5 = inlined_call_operand.vmem [shape: bf16[5,144,120], index: 5, kind: input, shape index: {}]   ;;  %s6295_s6 = inlined_call_operand.vmem [shape: f32[1,120], index: 6, kind: input, shape index: {}]   ;;  %s6296_s7 = inlined_call_operand.vmem [shape: bf16[120,84], index: 7, kind: input, shape index: {}]   ;;  %s6297_s8 = inlined_call_operand.vmem [shape: f32[1,84], index: 8, kind: input, shape index: {}]   ;;  %s6298_s9 = inlined_call_operand.vmem [shape: bf16[84,10], index: 9, kind: input, shape index: {}]   ;;  %s6299_s10 = inlined_call_operand.vmem [shape: f32[1,10], index: 10, kind: input, shape index: {}]   ;;  %s6300_s11 = inlined_call_operand.hbm [shape: f32[2,10], index: 11, kind: output, shape index: {}]  }
   0x1   :  { %v4380_v0 = vld [vmem:[%s6290_s1 + $0x64] ss:$8 sps:$4 sm:$0xff]   ;;  %v4382_v1 = vld [vmem:[%s6290_s1 + $0x60] ss:$8 sps:$4 sm:$0xff]   ;;  %194 = vmatprep.mubr.bf16.mxu0 %v4713_v2  ;;  %v4383_v3 = vld [vmem:[%s6290_s1 + $0x74] ss:$8 sps:$4 sm:$0xff]  }
   0x2   :  { %162 = vmatprep.subr.bf16.mxu0 %v4380_v0  ;;  %v4385_v4 = vld [vmem:[%s6290_s1 + $0x70] ss:$8 sps:$4 sm:$0xff]   ;;  %v4386_v5 = vld [vmem:[%s6290_s1 + $0x84] ss:$8 sps:$4 sm:$0xff]   ;;  %v4388_v6 = vld [vmem:[%s6290_s1 + $0x80] ss:$8 sps:$4 sm:$0xff]  }
   0x3   :  { %163 = vmatpush1.bf16.msra.mxu0 %v4382_v1  ;;  %v4389_v7 = vld [vmem:[%s6290_s1 + $0x94] ss:$8 sps:$4 sm:$0xff]   ;;  %v4391_v8 = vld [vmem:[%s6290_s1 + $0x90] ss:$8 sps:$4 sm:$0xff]   ;;  %v4392_v9 = vld [vmem:[%s6290_s1 + $0xa4] ss:$8 sps:$4 sm:$0xff]  }
   0x4   :  { %164 = vmatprep.subr.bf16.mxu0 %v4383_v3  ;;  %v4394_v10 = vld [vmem:[%s6290_s1 + $0xa0] ss:$8 sps:$4 sm:$0xff]   ;;  %v4395_v11 = vld [vmem:[%s6290_s1 + $0xb4] ss:$8 sps:$4 sm:$0xff]   ;;  %v4397_v12 = vld [vmem:[%s6290_s1 + $0xb0] ss:$8 sps:$4 sm:$0xff]  }
   0x5   :  { %v64_v13 = vld [vmem:[%s6289_s0 + $0x1] sm:$0xff]  ;;  %v65_v14 = vld [vmem:[%s6289_s0 + $0x9] sm:$0xff]  ;;  %v4403_v18 = vld [vmem:[%s6290_s1 + $0x14] ss:$8 sps:$4 sm:$0xff]  }
   0x6   :  { %v4400_v15 = vld [vmem:[%s6290_s1 + $0x4] ss:$8 sps:$4 sm:$0xff]   ;;  %v72_v16 = vpack.c.bf16 %v65_v14, %v64_v13  ;;  %v4398_v17 = vld [vmem:[%s6290_s1] ss:$8 sps:$4 sm:$0xff]   ;;  %v4401_v19 = vld [vmem:[%s6290_s1 + $0x10] ss:$8 sps:$4 sm:$0xff]  }
   0x7   :  { %165 = vmatpush1.bf16.msra.mxu0 %v4385_v4  ;;  %v66_v20 = vld [vmem:[%s6289_s0 + $0x11] sm:$0xff]  ;;  %v67_v21 = vld [vmem:[%s6289_s0 + $0x19] sm:$0xff]  ;;  %v4406_v22 = vld [vmem:[%s6290_s1 + $0x24] ss:$8 sps:$4 sm:$0xff]  }
   0x8   :  { %166 = vmatprep.subr.bf16.mxu0 %v4386_v5  ;;  %v73_v23 = vpack.c.bf16 %v67_v21, %v66_v20  ;;  %v4404_v24 = vld [vmem:[%s6290_s1 + $0x20] ss:$8 sps:$4 sm:$0xff]   ;;  %v4409_v25 = vld [vmem:[%s6290_s1 + $0x34] ss:$8 sps:$4 sm:$0xff]   ;;  %v4407_v28 = vld [vmem:[%s6290_s1 + $0x30] ss:$8 sps:$4 sm:$0xff]  }
   0x9   :  { %v68_v26 = vld [vmem:[%s6289_s0 + $0x21] sm:$0xff]  ;;  %v69_v27 = vld [vmem:[%s6289_s0 + $0x29] sm:$0xff]  ;;  %v4415_v32 = vld [vmem:[%s6290_s1 + $0x54] ss:$8 sps:$4 sm:$0xff]  }
   0xa   :  { %v4412_v29 = vld [vmem:[%s6290_s1 + $0x44] ss:$8 sps:$4 sm:$0xff]   ;;  %v74_v30 = vpack.c.bf16 %v69_v27, %v68_v26  ;;  %v4410_v31 = vld [vmem:[%s6290_s1 + $0x40] ss:$8 sps:$4 sm:$0xff]   ;;  %v70_v33 = vld [vmem:[%s6289_s0 + $0x31] sm:$0xff] }
   0xb   :  { %167 = vmatpush1.bf16.msra.mxu0 %v4388_v6  ;;  %v71_v34 = vld [vmem:[%s6289_s0 + $0x39] sm:$0xf]  ;;  %v4418_v36 = vld [vmem:[%s6290_s1 + $0xc4] ss:$8 sps:$4 sm:$0xff]   ;;  %v4416_v40 = vld [vmem:[%s6290_s1 + $0xc0] ss:$8 sps:$4 sm:$0xff]  }
   0xc   :  { %168 = vmatprep.subr.bf16.mxu0 %v4389_v7  ;;  %v4413_v35 = vld [vmem:[%s6290_s1 + $0x50] ss:$8 sps:$4 sm:$0xff]   ;;  %v75_v37 = vpack.c.bf16 %v71_v34, %v70_v33  ;;  %v40_v38 = vld [vmem:[%s6289_s0] sm:$0xff]  ;;  %v41_v39 = vld [vmem:[%s6289_s0 + $0x8] sm:$0xff] }
   0xd   :  { %v48_v41 = vpack.c.bf16 %v41_v39, %v40_v38  ;;  %v4421_v42 = vld [vmem:[%s6290_s1 + $0xd4] ss:$8 sps:$4 sm:$0xff]   ;;  %v4419_v43 = vld [vmem:[%s6290_s1 + $0xd0] ss:$8 sps:$4 sm:$0xff]   ;;  %v4424_v46 = vld [vmem:[%s6290_s1 + $0xe4] ss:$8 sps:$4 sm:$0xff]  }
   0xe   :  { %v42_v44 = vld [vmem:[%s6289_s0 + $0x10] sm:$0xff]  ;;  %v43_v45 = vld [vmem:[%s6289_s0 + $0x18] sm:$0xff]  ;;  %v4422_v47 = vld [vmem:[%s6290_s1 + $0xe0] ss:$8 sps:$4 sm:$0xff]  }
   0xf   :  { %169 = vmatpush1.bf16.msra.mxu0 %v4391_v8  ;;  %v49_v48 = vpack.c.bf16 %v43_v45, %v42_v44  ;;  %v4427_v49 = vld [vmem:[%s6290_s1 + $0xf4] ss:$8 sps:$4 sm:$0xff]   ;;  %v44_v50 = vld [vmem:[%s6289_s0 + $0x20] sm:$0xff]  ;;  %v45_v51 = vld [vmem:[%s6289_s0 + $0x28] sm:$0xff] }
  0x10   :  { %170 = vmatprep.subr.bf16.mxu0 %v4392_v9  ;;  %v4425_v52 = vld [vmem:[%s6290_s1 + $0xf0] ss:$8 sps:$4 sm:$0xff]   ;;  %v4430_v53 = vld [vmem:[%s6290_s1 + $0x104] ss:$8 sps:$4 sm:$0xff]   ;;  %v4428_v54 = vld [vmem:[%s6290_s1 + $0x100] ss:$8 sps:$4 sm:$0xff]   ;;  %v50_v55 = vpack.c.bf16 %v45_v51, %v44_v50 }
  0x11   :  { %v4433_v56 = vld [vmem:[%s6290_s1 + $0x114] ss:$8 sps:$4 sm:$0xff]   ;;  %v47_v58 = vld [vmem:[%s6289_s0 + $0x38] sm:$0xf]  ;;  %v4436_v60 = vld [vmem:[%s6290_s1 + $0x124] ss:$8 sps:$4 sm:$0xff]  }
  0x12   :  { %v46_v57 = vld [vmem:[%s6289_s0 + $0x30] sm:$0xff]  ;;  %v380_v62 = vld [vmem:[%s6289_s0 + $0x2] sm:$0xff]  ;;  %v383_v6 = vld [vmem:[%s6289_s0 + $0x1a] sm:$0xff] }
  0x13   :  { %171 = vmatpush1.bf16.msra.mxu0 %v4394_v10  ;;  %v4431_v59 = vld [vmem:[%s6290_s1 + $0x110] ss:$8 sps:$4 sm:$0xff]   ;;  %v51_v61 = vpack.c.bf16 %v47_v58, %v46_v57  ;;  %v4434_v0 = vld [vmem:[%s6290_s1 + $0x120] ss:$8 sps:$4 sm:$0xff]   ;;  %v4439_v3 = vld [vmem:[%s6290_s1 + $0x134] ss:$8 sps:$4 sm:$0xff]  }
  0x14   :  { %172 = vmatprep.subr.bf16.mxu0 %v4395_v11  ;;  %v381_v63 = vld [vmem:[%s6289_s0 + $0xa] sm:$0xff]  ;;  %v382_v5 = vld [vmem:[%s6289_s0 + $0x12] sm:$0xff]  ;;  %v384_v11 = vld [vmem:[%s6289_s0 + $0x22] sm:$0xff] }
  0x15   :  { %v388_v1 = vpack.c.bf16 %v381_v63, %v380_v62  ;;  %v4437_v4 = vld [vmem:[%s6290_s1 + $0x130] ss:$8 sps:$4 sm:$0xff]   ;;  %v4442_v7 = vld [vmem:[%s6290_s1 + $0x144] ss:$8 sps:$4 sm:$0xff]   ;;  %v4440_v8 = vld [vmem:[%s6290_s1 + $0x140] ss:$8 sps:$4 sm:$0xff]   ;;  %v389_v9 = vpack.c.bf16 %v383_v6, %v382_v5 }
  0x16   :  { %v4445_v10 = vld [vmem:[%s6290_s1 + $0x154] ss:$8 sps:$4 sm:$0xff]   ;;  %v4443_v13 = vld [vmem:[%s6290_s1 + $0x150] ss:$8 sps:$4 sm:$0xff]   ;;  %v4448_v14 = vld [vmem:[%s6290_s1 + $0x164] ss:$8 sps:$4 sm:$0xff]  }
  0x17   :  { %173 = vmatpush1.bf16.msra.mxu0 %v4397_v12  ;;  %v385_v12 = vld [vmem:[%s6289_s0 + $0x2a] sm:$0xff]  ;;  %v4457_v27 = vld [vmem:[%s6290_s1 + $0x194] ss:$8 sps:$4 sm:$0xff]  }
  0x18   :  { %307 = vmatprep.subr.bf16.mxu0 %v4400_v15  ;;  %v4446_v15 = vld [vmem:[%s6290_s1 + $0x160] ss:$8 sps:$4 sm:$0xff]   ;;  %v4449_v20 = vld [vmem:[%s6290_s1 + $0x170] ss:$8 sps:$4 sm:$0xff]   ;;  %v4454_v21 = vld [vmem:[%s6290_s1 + $0x184] ss:$8 sps:$4 sm:$0xff]  }
  0x1a   :  { %3625 = vmatmul.mubr.msk.bf16.vlgmr.msra.gmra.mrb[0].mxu0 %vm149_vm0, %v72_v16  ;;  %v390_v16 = vpack.c.bf16 %v385_v12, %v384_v11 }
  0x1b   :  { %308 = vmatpush1.bf16.msra.mxu0 %v4398_v17  ;;  %204 = vmatprep.mubr.bf16.mxu0 %v4713_v2  ;;  %v4451_v17 = vld [vmem:[%s6290_s1 + $0x174] ss:$8 sps:$4 sm:$0xff]  }
  0x1c   :  { %309 = vmatprep.subr.bf16.mxu0 %v4403_v18  ;;  %v386_v18 = vld [vmem:[%s6289_s0 + $0x32] sm:$0xff] }
  0x1f   :  { %310 = vmatpush1.bf16.msra.mxu0 %v4401_v19  ;;  %v387_v19 = vld [vmem:[%s6289_s0 + $0x3a] sm:$0xf] }
  0x20   :  { %311 = vmatprep.subr.bf16.mxu0 %v4406_v22  ;;  %v391_v22 = vpack.c.bf16 %v387_v19, %v386_v18 }
  0x22   :  { %3626 = vmatmul.mubr.msk.bf16.gmra.mrb[4].mxu0 %vm149_vm0, %v73_v23  ;;  %v566_v23 = vld [vmem:[%s6289_s0 + $0x3] sm:$0xff] }
  0x23   :  { %312 = vmatpush1.bf16.msra.mxu0 %v4404_v24  ;;  %214 = vmatprep.mubr.bf16.mxu0 %v4713_v2  ;;  %v567_v24 = vld [vmem:[%s6289_s0 + $0xb] sm:$0xff] }
  0x24   :  { %313 = vmatprep.subr.bf16.mxu0 %v4409_v25  ;;  %v4452_v25 = vld [vmem:[%s6290_s1 + $0x180] ss:$8 sps:$4 sm:$0xff]   ;;  %v574_v26 = vpack.c.bf16 %v567_v24, %v566_v23 }
  0x27   :  { %314 = vmatpush1.bf16.msra.mxu0 %v4407_v28  ;;  %v4455_v28 = vld [vmem:[%s6290_s1 + $0x190] ss:$8 sps:$4 sm:$0xff]  }
  0x28   :  { %315 = vmatprep.subr.bf16.mxu0 %v4412_v29  ;;  %v568_v29 = vld [vmem:[%s6289_s0 + $0x13] sm:$0xff] }
  0x2a   :  { %3627 = vmatmul.mubr.msk.bf16.gmra.mrb[8].mxu0 %vm149_vm0, %v74_v30  ;;  %v569_v30 = vld [vmem:[%s6289_s0 + $0x1b] sm:$0xff] }
  0x2b   :  { %224 = vmatprep.mubr.bf16.mxu0 %v4713_v2  ;;  %316 = vmatpush1.bf16.msra.mxu0 %v4410_v31  ;;  %v4460_v31 = vld [vmem:[%s6290_s1 + $0x1a4] ss:$8 sps:$4 sm:$0xff]  }
  0x2c   :  { %317 = vmatprep.subr.bf16.mxu0 %v4415_v32 }
  0x2f   :  { %318 = vmatpush1.bf16.msra.mxu0 %v4413_v35 }
  0x30   :  { %477 = vmatprep.subr.bf16.mxu0 %v4418_v36 }
  0x32   :  { %3628 = vmatmul.mubr.msk.bf16.gmra.mrb[12].mxu0 %vm149_vm0, %v75_v37 }
  0x33   :  { %339 = vmatprep.mubr.bf16.mxu0 %v4713_v2 }
  0x3a   :  { %3641 = vmatmul.mubr.msk.bf16.vlgmr.msra.gmra.mrb[0].mxu0 %vm149_vm0, %v48_v41 }
  0x3b   :  { %478 = vmatpush1.bf16.msra.mxu0 %v4416_v40  ;;  %349 = vmatprep.mubr.bf16.mxu0 %v4713_v2 }
  0x3c   :  { %479 = vmatprep.subr.bf16.mxu0 %v4421_v42 }
  0x3f   :  { %480 = vmatpush1.bf16.msra.mxu0 %v4419_v43 }
  0x40   :  { %481 = vmatprep.subr.bf16.mxu0 %v4424_v46 }
  0x42   :  { %3642 = vmatmul.mubr.msk.bf16.gmra.mrb[4].mxu0 %vm149_vm0, %v49_v48 }
  0x43   :  { %482 = vmatpush1.bf16.msra.mxu0 %v4422_v47  ;;  %359 = vmatprep.mubr.bf16.mxu0 %v4713_v2 }
  0x44   :  { %483 = vmatprep.subr.bf16.mxu0 %v4427_v49 }
  0x47   :  { %484 = vmatpush1.bf16.msra.mxu0 %v4425_v52 }
  0x48   :  { %485 = vmatprep.subr.bf16.mxu0 %v4430_v53 }
  0x4a   :  { %3643 = vmatmul.mubr.msk.bf16.gmra.mrb[8].mxu0 %vm149_vm0, %v50_v55 }
  0x4b   :  { %369 = vmatprep.mubr.bf16.mxu0 %v4713_v2  ;;  %486 = vmatpush1.bf16.msra.mxu0 %v4428_v54 }
  0x4c   :  { %487 = vmatprep.subr.bf16.mxu0 %v4433_v56 }
  0x4f   :  { %488 = vmatpush1.bf16.msra.mxu0 %v4431_v59 }
  0x50   :  { %663 = vmatprep.subr.bf16.mxu0 %v4436_v60 }
  0x52   :  { %3644 = vmatmul.mubr.msk.bf16.gmra.mrb[12].mxu0 %vm149_vm0, %v51_v61 }
  0x53   :  { %509 = vmatprep.mubr.bf16.mxu0 %v4713_v2 }
  0x5a   :  { %3669 = vmatmul.mubr.msk.bf16.vlgmr.msra.gmra.mrb[0].mxu0 %vm149_vm0, %v388_v1 }
  0x5b   :  { %664 = vmatpush1.bf16.msra.mxu0 %v4434_v0  ;;  %519 = vmatprep.mubr.bf16.mxu0 %v4713_v2 }
  0x5c   :  { %665 = vmatprep.subr.bf16.mxu0 %v4439_v3 }
  0x5f   :  { %666 = vmatpush1.bf16.msra.mxu0 %v4437_v4 }
  0x60   :  { %667 = vmatprep.subr.bf16.mxu0 %v4442_v7 }
  0x62   :  { %3670 = vmatmul.mubr.msk.bf16.gmra.mrb[4].mxu0 %vm149_vm0, %v389_v9 }
  0x63   :  { %668 = vmatpush1.bf16.msra.mxu0 %v4440_v8  ;;  %529 = vmatprep.mubr.bf16.mxu0 %v4713_v2 }
  0x64   :  { %669 = vmatprep.subr.bf16.mxu0 %v4445_v10 }
  0x67   :  { %670 = vmatpush1.bf16.msra.mxu0 %v4443_v13 }
  0x68   :  { %671 = vmatprep.subr.bf16.mxu0 %v4448_v14 }
  0x6a   :  { %3671 = vmatmul.mubr.msk.bf16.gmra.mrb[8].mxu0 %vm149_vm0, %v390_v16 }
  0x6b   :  { %539 = vmatprep.mubr.bf16.mxu0 %v4713_v2  ;;  %672 = vmatpush1.bf16.msra.mxu0 %v4446_v15 }
  0x6c   :  { %673 = vmatprep.subr.bf16.mxu0 %v4451_v17 }
  0x6f   :  { %674 = vmatpush1.bf16.msra.mxu0 %v4449_v20 }
  0x70   :  { %849 = vmatprep.subr.bf16.mxu0 %v4454_v21 }
  0x72   :  { %3672 = vmatmul.mubr.msk.bf16.gmra.mrb[12].mxu0 %vm149_vm0, %v391_v22 }
  0x73   :  { %695 = vmatprep.mubr.bf16.mxu0 %v4713_v2 }
  0x7a   :  { %3697 = vmatmul.mubr.msk.bf16.vlgmr.msra.gmra.mrb[0].mxu0 %vm149_vm0, %v574_v26 }
  0x7b   :  { %850 = vmatpush1.bf16.msra.mxu0 %v4452_v25  ;;  %705 = vmatprep.mubr.bf16.mxu0 %v4713_v2 }
  0x7c   :  { %851 = vmatprep.subr.bf16.mxu0 %v4457_v27 }
  0x7d   :  { %16 = vsyncpa [#allocation3], 0  ;;  %v575_v32 = vpack.c.bf16 %v569_v30, %v568_v29  ;;  %v4458_v33 = vld [vmem:[%s6290_s1 + $0x1a0] ss:$8 sps:$4 sm:$0xff]   ;;  %v4463_v34 = vld [vmem:[%s6290_s1 + $0x1b4] ss:$8 sps:$4 sm:$0xff]   ;;  %v940_v6 = vlaneseq }
  0x7e   :  { %v570_v35 = vld [vmem:[%s6289_s0 + $0x23] sm:$0xff]  ;;  %v571_v36 = vld [vmem:[%s6289_s0 + $0x2b] sm:$0xff]  ;;  %v4469_v41 = vld [vmem:[%s6290_s1 + $0x1d4] ss:$8 sps:$4 sm:$0xff]   ;;  %vm998_vm1 = vcmask 1046528   ;;  %s4714_s21 = smov 122  }
  0x7f   :  { %852 = vmatpush1.bf16.msra.mxu0 %v4455_v28  ;;  %v4461_v37 = vld [vmem:[%s6290_s1 + $0x1b0] ss:$8 sps:$4 sm:$0xff]   ;;  %v4466_v38 = vld [vmem:[%s6290_s1 + $0x1c4] ss:$8 sps:$4 sm:$0xff]   ;;  %v576_v39 = vpack.c.bf16 %v571_v36, %v570_v35  ;;  %v4464_v40 = vld [vmem:[%s6290_s1 + $0x1c0] ss:$8 sps:$4 sm:$0xff]  }
  0x80   :  { %853 = vmatprep.subr.bf16.mxu0 %v4460_v31  ;;  %v572_v42 = vld [vmem:[%s6289_s0 + $0x33] sm:$0xff]  ;;  %v573_v43 = vld [vmem:[%s6289_s0 + $0x3b] sm:$0xf]  ;;  %v752_v46 = vld [vmem:[%s6289_s0 + $0x4] sm:$0xff]  ;;  %v5153_v7 = vshrl.u32 %v940_v6, 7  ;;  %vm1346_vm2 = vcmask 1040384  }
  0x81   :  { %v4467_v44 = vld [vmem:[%s6290_s1 + $0x1d0] ss:$8 sps:$4 sm:$0xff]   ;;  %v577_v45 = vpack.c.bf16 %v573_v43, %v572_v42  ;;  %v755_v50 = vld [vmem:[%s6289_s0 + $0x1c] sm:$0xff]  ;;  %v756_v52 = vld [vmem:[%s6289_s0 + $0x24] sm:$0xff]  ;;  %vm1109_vm3 = vcmask 998400   ;;  %vm1333_vm4 = vcmask 277504  }
  0x82   :  { %3698 = vmatmul.mubr.msk.bf16.gmra.mrb[4].mxu0 %vm149_vm0, %v575_v32  ;;  %v753_v47 = vld [vmem:[%s6289_s0 + $0xc] sm:$0xff]  ;;  %v754_v49 = vld [vmem:[%s6289_s0 + $0x14] sm:$0xff]  ;;  %v759_v56 = vld [vmem:[%s6289_s0 + $0x3c] sm:$0xf]  ;;  %v942_v8 = vsub.s32 0, %v5153_v7  ;;  %v946_v10 = vsub.s32 1, %v5153_v7 }
  0x83   :  { %854 = vmatpush1.bf16.msra.mxu0 %v4458_v33  ;;  %715 = vmatprep.mubr.bf16.mxu0 %v4713_v2  ;;  %v760_v48 = vpack.c.bf16 %v753_v47, %v752_v46  ;;  %v761_v51 = vpack.c.bf16 %v755_v50, %v754_v49  ;;  %v757_v53 = vld [vmem:[%s6289_s0 + $0x2c] sm:$0xff]  ;;  %v758_v55 = vld [vmem:[%s6289_s0 + $0x34] sm:$0xff]  ;;  %v4473_v60 = vld [vmem:[%s6292_s3 + $0xbc] ss:$8 sps:$4 sm:$0xff]   ;;  %vm1640_vm5 = vcmask 1045504   ;;  %vm1893_vm6 = vcmask 1044480  }
  0x84   :  { %855 = vmatprep.subr.bf16.mxu0 %v4463_v34  ;;  %v762_v54 = vpack.c.bf16 %v757_v53, %v756_v52  ;;  %v763_v57 = vpack.c.bf16 %v759_v56, %v758_v55  ;;  %v4470_v58 = vld [vmem:[%s6292_s3 + $0xac] ss:$8 sps:$4 sm:$0xff]   ;;  %v4472_v59 = vld [vmem:[%s6292_s3 + $0xa8] ss:$8 sps:$4 sm:$0xff]   ;;  %v4475_v61 = vld [vmem:[%s6292_s3 + $0xb8] ss:$8 sps:$4 sm:$0xff]  }
  0x85   :  { %1353 = vmatprep.subr.bf16.mxu1 %v4470_v58  ;;  %v4476_v62 = vld [vmem:[%s6292_s3 + $0xcc] ss:$8 sps:$4 sm:$0xff]   ;;  %v4478_v63 = vld [vmem:[%s6292_s3 + $0xc8] ss:$8 sps:$4 sm:$0xff]   ;;  %v4479_v0 = vld [vmem:[%s6292_s3 + $0xdc] ss:$8 sps:$4 sm:$0xff]  }
  0x86   :  { %1354 = vmatpush1.bf16.msra.mxu1 %v4472_v59  ;;  %v4481_v1 = vld [vmem:[%s6292_s3 + $0xd8] ss:$8 sps:$4 sm:$0xff]   ;;  %v4482_v3 = vld [vmem:[%s6292_s3 + $0xec] ss:$8 sps:$4 sm:$0xff]   ;;  %v4484_v4 = vld [vmem:[%s6292_s3 + $0xe8] ss:$8 sps:$4 sm:$0xff]  }
  0x87   :  { %856 = vmatpush1.bf16.msra.mxu0 %v4461_v37  ;;  %1355 = vmatprep.subr.bf16.mxu1 %v4473_v60  ;;  %v4485_v5 = vld [vmem:[%s6292_s3 + $0xfc] ss:$8 sps:$4 sm:$0xff]   ;;  %v938_v9 = vld [vmem:[%s6291_s2] sm:$0x3]  ;;  %v4488_v22 = vld [vmem:[%s6292_s3 + $0x10c] ss:$8 sps:$4 sm:$0xff]  }
  0x88   :  { %857 = vmatprep.subr.bf16.mxu0 %v4466_v38  ;;  %v5162_v11 = vrot.slane %v938_v9, %v942_v8  ;;  %v5166_v12 = vrot.slane %v938_v9, %v946_v10  ;;  %v4487_v14 = vld [vmem:[%s6292_s3 + $0xf8] ss:$8 sps:$4 sm:$0xff]   ;;  %v4490_v25 = vld [vmem:[%s6292_s3 + $0x108] ss:$8 sps:$4 sm:$0xff]   ;;  %v4491_v30 = vld [vmem:[%s6292_s3 + $0x11c] ss:$8 sps:$4 sm:$0xff]  }
  0x89   :  { %v4493_v34 = vld [vmem:[%s6292_s3 + $0x118] ss:$8 sps:$4 sm:$0xff]   ;;  %v4494_v46 = vld [vmem:[%s6292_s3 + $0x12c] ss:$8 sps:$4 sm:$0xff]   ;;  %v4496_v49 = vld [vmem:[%s6292_s3 + $0x128] ss:$8 sps:$4 sm:$0xff]  }
  0x8a   :  { %3699 = vmatmul.mubr.msk.bf16.gmra.mrb[8].mxu0 %vm149_vm0, %v576_v39  ;;  %1356 = vmatpush1.bf16.msra.mxu1 %v4475_v61  ;;  %v4639_v7 = vld [vmem:[%s6294_s5 + $0x60] sm:$0xff]   ;;  %s4715_s25 = smov 112   ;;  %vm2509_vm7 = vcmask 916480   ;;  %vm2661_vm8 = vcmask 130048   ;;  %vm3398_vm9 = vcmask 1043456   ;;  %vm4717_vm10 = vmmov 0  }
  0x8b   :  { %725 = vmatprep.mubr.bf16.mxu0 %v4713_v2  ;;  %858 = vmatpush1.bf16.msra.mxu0 %v4464_v40  ;;  %vm3388_vm11 = vcmask 982016   ;;  %vm3527_vm12 = vcmask 1041408   ;;  %vm3517_vm13 = vcmask 687104   ;;  %vm3584_vm14 = vcmask 73728   ;;  %s4718_s20 = smov [#allocation2]  }
  0x8c   :  { %859 = vmatprep.subr.bf16.mxu0 %v4469_v41  ;;  %1357 = vmatprep.subr.bf16.mxu1 %v4476_v62  ;;  %v4499_v62 = vld [vmem:[%s6292_s3 + $0x138] ss:$8 sps:$4 sm:$0xff]  }
  0x8e   :  { %1358 = vmatpush1.bf16.msra.mxu1 %v4478_v63 }
  0x8f   :  { %860 = vmatpush1.bf16.msra.mxu0 %v4467_v44  ;;  %1359 = vmatprep.subr.bf16.mxu1 %v4479_v0 }
  0x90   :  { %2671 = vmatprep.subr.bf16.mxu0 %v4713_v2 }
  0x92   :  { %3700 = vmatmul.mubr.msk.bf16.gmra.mrb[12].mxu0 %vm149_vm0, %v577_v45  ;;  %1360 = vmatpush1.bf16.msra.mxu1 %v4481_v1 }
  0x93   :  { %881 = vmatprep.mubr.bf16.mxu0 %v4713_v2  ;;  %1361 = vmatprep.subr.bf16.mxu1 %v4482_v3 }
  0x96   :  { %1362 = vmatpush1.bf16.msra.mxu1 %v4484_v4 }
  0x97   :  { %1363 = vmatprep.subr.bf16.mxu1 %v4485_v5 }
  0x9a   :  { %3725 = vmatmul.mubr.msk.bf16.vlgmr.msra.gmra.mrb[0].mxu0 %vm149_vm0, %v760_v48  ;;  %1364 = vmatpush1.bf16.msra.mxu1 %v4487_v14 }
  0x9b   :  { %891 = vmatprep.mubr.bf16.mxu0 %v4713_v2  ;;  %1365 = vmatprep.subr.bf16.mxu1 %v4488_v22 }
  0x9e   :  { %1366 = vmatpush1.bf16.msra.mxu1 %v4490_v25 }
  0x9f   :  { %1367 = vmatprep.subr.bf16.mxu1 %v4491_v30 }
  0xa2   :  { %3726 = vmatmul.mubr.msk.bf16.gmra.mrb[4].mxu0 %vm149_vm0, %v761_v51  ;;  %1368 = vmatpush1.bf16.msra.mxu1 %v4493_v34 }
  0xa3   :  { %901 = vmatprep.mubr.bf16.mxu0 %v4713_v2  ;;  %1369 = vmatprep.subr.bf16.mxu1 %v4494_v46 }
  0xa6   :  { %1370 = vmatpush1.bf16.msra.mxu1 %v4496_v49 }
  0xaa   :  { %3727 = vmatmul.mubr.msk.bf16.gmra.mrb[8].mxu0 %vm149_vm0, %v762_v54 }
  0xab   :  { %911 = vmatprep.mubr.bf16.mxu0 %v4713_v2 }
  0xb2   :  { %3728 = vmatmul.mubr.msk.bf16.gmra.mrb[12].mxu0 %vm149_vm0, %v763_v57  ;;  %v4497_v57 = vld [vmem:[%s6292_s3 + $0x13c] ss:$8 sps:$4 sm:$0xff]  }
  0xb3   :  { %1371 = vmatprep.subr.bf16.mxu1 %v4497_v57 }
  0xb4   :  { %1372 = vmatpush1.bf16.msra.mxu1 %v4499_v62 }
 0x16d   :  { %v883_v13 = vpop.f32.mrb[0].mxu0 }
 0x16e   :  { %v950_v15 = vadd.f32 %v5162_v11, %v883_v13  ;;  %v885_v16 = vpop.f32.mrb[1].mxu0  ;;  %v3749_v13 = vld [vmem:[%s6292_s3 + $0x148] sm:$0x11] }
 0x16f   :  { %v951_v17 = vadd.f32 %v5166_v12, %v885_v16  ;;  %v887_v18 = vpop.f32.mrb[2].mxu0  ;;  %v3770_v25 = vcombine.low %v3749_v13, %v3749_v13 }
 0x170   :  { %v966_v19 = vmax.f32 %v950_v15, 0.0  ;;  %v952_v20 = vadd.f32 %v5162_v11, %v887_v18  ;;  %v889_v21 = vpop.f32.mrb[3].mxu0 }
 0x171   :  { %v967_v23 = vmax.f32 %v951_v17, 0.0  ;;  %v953_v24 = vadd.f32 %v5166_v12, %v889_v21  ;;  %v3771_v21 = vcombine.high %v3749_v13, %v3749_v13  ;;  %v1348_v30 = vsel %vm1346_vm2, %v3770_v25, 0 }
 0x172   :  { %v968_v26 = vmax.f32 %v952_v20, 0.0  ;;  %v999_v28 = vrot.slane %v966_v19, 1 }
 0x173   :  { %v969_v27 = vmax.f32 %v953_v24, 0.0  ;;  %v1002_v31 = vrot.slane %v967_v23, 1  ;;  %3772 = vmatprep.subr.msk.bf16.mxu1 %vm1346_vm2, %v3771_v21 }
 0x174   :  { %v1000_v29 = vrot.slane %v968_v26, 1  ;;  %1374 = vmatpush1.bf16.msra.mxu1 %v1348_v30 }
 0x175   :  { %v1003_v32 = vrot.slane %v969_v27, 1  ;;  %v893_v33 = vpop.f32.mrb[4].mxu0 }
 0x176   :  { %v954_v35 = vadd.f32 %v5162_v11, %v893_v33  ;;  %v895_v36 = vpop.f32.mrb[5].mxu0  ;;  %v1001_v37 = vsel %vm998_vm1, %v999_v28, %v1000_v29 }
 0x177   :  { %v955_v38 = vadd.f32 %v5166_v12, %v895_v36  ;;  %v897_v39 = vpop.f32.mrb[6].mxu0  ;;  %v1004_v40 = vsel %vm998_vm1, %v1002_v31, %v1003_v32  ;;  %v5191_v41 = vmax.f32 %v966_v19, %v1001_v37  ;;  %v4504_v31 = vld [vmem:[%s6292_s3 + $0x4] ss:$8 sps:$4 sm:$0xff]  }
 0x178   :  { %v970_v42 = vmax.f32 %v954_v35, 0.0  ;;  %v956_v43 = vadd.f32 %v5162_v11, %v897_v39  ;;  %v899_v44 = vpop.f32.mrb[7].mxu0  ;;  %v5194_v45 = vmax.f32 %v967_v23, %v1004_v40  ;;  %1547 = vmatprep.subr.bf16.mxu1 %v4504_v31 }
 0x179   :  { %v971_v47 = vmax.f32 %v955_v38, 0.0  ;;  %v957_v48 = vadd.f32 %v5166_v12, %v899_v44 }
 0x17a   :  { %v1005_v50 = vrot.slane %v970_v42, 1  ;;  %v972_v51 = vmax.f32 %v956_v43, 0.0  ;;  %v4305_v52 = vpack.i.bf16 %v5194_v45, %v5191_v41 }
 0x17b   :  { %v1007_v53 = vrot.slane %v971_v47, 1  ;;  %v973_v54 = vmax.f32 %v957_v48, 0.0 }
 0x17c   :  { %v1009_v55 = vrot.slane %v972_v51, 1  ;;  %4306 = vrot.lane.b32.xlu0 %v4305_v52, %s4714_s21  ;;  %v1006_v56 = vsel %vm998_vm1, %v1000_v29, %v1005_v50 }
 0x17d   :  { %v1011_v58 = vrot.slane %v973_v54, 1  ;;  %v903_v59 = vpop.f32.mrb[8].mxu0  ;;  %v1008_v60 = vsel %vm998_vm1, %v1003_v32, %v1007_v53  ;;  %v5211_v61 = vmax.f32 %v968_v26, %v1006_v56 }
 0x17e   :  { %v958_v63 = vadd.f32 %v5162_v11, %v903_v59  ;;  %v905_v0 = vpop.f32.mrb[9].mxu0  ;;  %v5217_v1 = vmax.f32 %v969_v27, %v1008_v60  ;;  %v1010_v3 = vsel %vm998_vm1, %v1005_v50, %v1009_v55 }
 0x17f   :  { %v959_v4 = vadd.f32 %v5166_v12, %v905_v0  ;;  %v907_v5 = vpop.f32.mrb[10].mxu0  ;;  %v1012_v6 = vsel %vm998_vm1, %v1007_v53, %v1011_v58  ;;  %v5222_v9 = vmax.f32 %v970_v42, %v1010_v3 }
 0x180   :  { %v974_v14 = vmax.f32 %v958_v63, 0.0  ;;  %v960_v15 = vadd.f32 %v5162_v11, %v907_v5  ;;  %v909_v16 = vpop.f32.mrb[11].mxu0  ;;  %v4310_v17 = vpack.i.bf16 %v5217_v1, %v5211_v61  ;;  %v5230_v18 = vmax.f32 %v971_v47, %v1012_v6 }
 0x181   :  { %v975_v19 = vmax.f32 %v959_v4, 0.0  ;;  %v961_v20 = vadd.f32 %v5166_v12, %v909_v16 }
 0x182   :  { %v1013_v22 = vrot.slane %v974_v14, 1  ;;  %v976_v23 = vmax.f32 %v960_v15, 0.0  ;;  %4311 = vrot.lane.b32.xlu0 %v4310_v17, %s4714_s21  ;;  %v4315_v24 = vpack.i.bf16 %v5230_v18, %v5222_v9 }
 0x183   :  { %v1015_v26 = vrot.slane %v975_v19, 1  ;;  %v977_v27 = vmax.f32 %v961_v20, 0.0 }
 0x184   :  { %v1017_v28 = vrot.slane %v976_v23, 1  ;;  %4316 = vrot.lane.b32.xlu1 %v4315_v24, %s4714_s21  ;;  %v1014_v29 = vsel %vm998_vm1, %v1009_v55, %v1013_v22 }
 0x185   :  { %v1019_v32 = vrot.slane %v977_v27, 1  ;;  %v913_v33 = vpop.f32.mrb[12].mxu0  ;;  %v1016_v34 = vsel %vm998_vm1, %v1011_v58, %v1015_v26  ;;  %v5244_v35 = vmax.f32 %v972_v51, %v1014_v29 }
 0x186   :  { %v962_v36 = vadd.f32 %v5162_v11, %v913_v33  ;;  %v915_v37 = vpop.f32.mrb[13].mxu0  ;;  %v5247_v38 = vmax.f32 %v973_v54, %v1016_v34  ;;  %v1018_v39 = vsel %vm998_vm1, %v1013_v22, %v1017_v28 }
 0x187   :  { %v963_v40 = vadd.f32 %v5166_v12, %v915_v37  ;;  %v917_v42 = vpop.f32.mrb[14].mxu0  ;;  %v1020_v43 = vsel %vm998_vm1, %v1015_v26, %v1019_v32  ;;  %v5252_v44 = vmax.f32 %v974_v14, %v1018_v39 }
 0x188   :  { %v978_v46 = vmax.f32 %v962_v36, 0.0  ;;  %v964_v47 = vadd.f32 %v5162_v11, %v917_v42  ;;  %v919_v48 = vpop.f32.mrb[15].mxu0  ;;  %v4320_v49 = vpack.i.bf16 %v5247_v38, %v5244_v35  ;;  %v5257_v50 = vmax.f32 %v975_v19, %v1020_v43 }
 0x189   :  { %v979_v51 = vmax.f32 %v963_v40, 0.0  ;;  %v965_v52 = vadd.f32 %v5166_v12, %v919_v48 }
 0x18a   :  { %v1021_v53 = vrot.slane %v978_v46, 1  ;;  %v980_v54 = vmax.f32 %v964_v47, 0.0  ;;  %4321 = vrot.lane.b32.xlu1 %v4320_v49, %s4714_s21  ;;  %v4325_v55 = vpack.i.bf16 %v5257_v50, %v5252_v44 }
 0x18b   :  { %v1023_v56 = vrot.slane %v979_v51, 1  ;;  %v981_v57 = vmax.f32 %v965_v52, 0.0 }
 0x18c   :  { %v1025_v58 = vrot.slane %v980_v54, 1  ;;  %4326 = vrot.lane.b32.xlu0 %v4325_v55, %s4714_s21  ;;  %v1022_v11 = vsel %vm998_vm1, %v1017_v28, %v1021_v53 }
 0x18d   :  { %v1027_v59 = vrot.slane %v981_v57, 1  ;;  %v1024_v60 = vsel %vm998_vm1, %v1019_v32, %v1023_v56  ;;  %v5266_v62 = vmax.f32 %v976_v23, %v1022_v11 }
 0x18e   :  { %v5268_v12 = vmax.f32 %v977_v27, %v1024_v60  ;;  %v1026_v63 = vsel %vm998_vm1, %v1021_v53, %v1025_v58  ;;  %v5274_v4 = vmax.f32 %v980_v54, %v1025_v58 }
 0x18f   :  { %v1028_v0 = vsel %vm998_vm1, %v1023_v56, %v1027_v59  ;;  %v5272_v3 = vmax.f32 %v978_v46, %v1026_v63  ;;  %v5276_v5 = vmax.f32 %v981_v57, %v1027_v59  ;;  %v4502_v59 = vld [vmem:[%s6292_s3] ss:$8 sps:$4 sm:$0xff]  }
 0x190   :  { %v4330_v6 = vpack.i.bf16 %v5268_v12, %v5266_v62  ;;  %v5280_v13 = vmax.f32 %v979_v51, %v1028_v0 }
 0x191   :  { %v4340_v15 = vpack.i.bf16 %v5276_v5, %v5274_v4 }
 0x192   :  { %4331 = vrot.lane.b32.xlu1 %v4330_v6, %s4714_s21  ;;  %v4335_v14 = vpack.i.bf16 %v5280_v13, %v5272_v3 }
 0x194   :  { %4336 = vrot.lane.b32.xlu0 %v4335_v14, %s4714_s21 }
 0x196   :  { %4341 = vrot.lane.b32.xlu1 %v4340_v15, %s4714_s21  ;;  %s3593_s21 = sshll.u32 %s4718_s20, 4  ;;  %s3594_s21 = int_to_ptr.vmem [resolvable:$true] %s3593_s21 }
 0x197   :  { %p4694_p1 = scmp.lt.s32.totalorder %s3594_s21, %s3594_s21 }
 0x1ee   :  { %v4307_v16 = vpop.permute.xlu0 %4306 }
 0x1ef   :  { %v4309_v19 = vunpack.i.h.bf16 %v4307_v16  ;;  %v4308_v20 = vunpack.i.l.bf16 %v4307_v16  ;;  %v4507_v16 = vld [vmem:[%s6292_s3 + $0x14] ss:$8 sps:$4 sm:$0xff]  }
 0x1f1   :  { %v1110_v28 = vsel %vm1109_vm3, %v4308_v20, %v4309_v19  ;;  %v1135_v31 = vmax.f32 %v5194_v45, %v4309_v19 }
 0x1f4   :  { %v4312_v17 = vpop.permute.xlu0 %4311 }
 0x1f5   :  { %v4314_v21 = vunpack.i.h.bf16 %v4312_v17  ;;  %v4313_v22 = vunpack.i.l.bf16 %v4312_v17 }
 0x1f6   :  { %v4317_v23 = vpop.permute.xlu1 %4316 }
 0x1f7   :  { %v1111_v24 = vsel %vm1109_vm3, %v4313_v22, %v4314_v21  ;;  %v4319_v25 = vunpack.i.h.bf16 %v4317_v23  ;;  %v4318_v26 = vunpack.i.l.bf16 %v4317_v23  ;;  %v5291_v27 = vmax.f32 %v5217_v1, %v4314_v21 }
 0x1f8   :  { %v5300_v32 = vmax.f32 %v5211_v61, %v1111_v24  ;;  %v1134_v1 = vmax.f32 %v5191_v41, %v1110_v28 }
 0x1f9   :  { %v5295_v29 = vmax.f32 %v5230_v18, %v4319_v25  ;;  %v1112_v30 = vsel %vm1109_vm3, %v4318_v26, %v4319_v25  ;;  %v5309_v36 = vpack.c.bf16 %v5291_v27, %v1135_v31 }
 0x1fa   :  { %v5303_v33 = vmax.f32 %v5222_v9, %v1112_v30  ;;  %v5314_v61 = vpack.c.bf16 %v5300_v32, %v1134_v1  ;;  %v4505_v1 = vld [vmem:[%s6292_s3 + $0x10] ss:$8 sps:$4 sm:$0xff]  }
 0x1fb   :  { %v2121_v34 = vpack.c.bf16 %v5295_v29, %v5291_v27  ;;  %v1213_v47 = vrot.slane %v5309_v36, 1  ;;  %v1644_v48 = vrot.slane %v5309_v36, 2  ;;  %v1897_v52 = vrot.slane %v5309_v36, 3  ;;  %v4627_v27 = vld [vmem:[%s6292_s3 + $0x334] ss:$8 sps:$4 sm:$0xff]  }
 0x1fc   :  { %v2120_v18 = vpack.c.bf16 %v5303_v33, %v5300_v32  ;;  %v4322_v37 = vpop.permute.xlu1 %4321  ;;  %v1210_v54 = vrot.slane %v5314_v61, 1  ;;  %v1641_v55 = vrot.slane %v5314_v61, 2  ;;  %v1894_v23 = vrot.slane %v5314_v61, 3 }
 0x1fd   :  { %v4324_v39 = vunpack.i.h.bf16 %v4322_v37  ;;  %v4323_v45 = vunpack.i.l.bf16 %v4322_v37 }
 0x1fe   :  { %v4327_v40 = vpop.permute.xlu0 %4326 }
 0x1ff   :  { %v5317_v9 = vmax.f32 %v5247_v38, %v4324_v39  ;;  %v1113_v41 = vsel %vm1109_vm3, %v4323_v45, %v4324_v39  ;;  %v4329_v42 = vunpack.i.h.bf16 %v4327_v40  ;;  %v4328_v43 = vunpack.i.l.bf16 %v4327_v40  ;;  %v4510_v40 = vld [vmem:[%s6292_s3 + $0x24] ss:$8 sps:$4 sm:$0xff]  }
 0x200   :  { %v5321_v46 = vmax.f32 %v5244_v35, %v1113_v41 }
 0x201   :  { %v5327_v49 = vpack.c.bf16 %v5317_v9, %v5295_v29  ;;  %v5330_v51 = vmax.f32 %v5257_v50, %v4329_v42  ;;  %v1114_v38 = vsel %vm1109_vm3, %v4328_v43, %v4329_v42  ;;  %v3920_v29 = vld [vmem:[%s6292_s3 + $0x340] sm:$0x11] }
 0x202   :  { %v5336_v35 = vpack.c.bf16 %v5321_v46, %v5303_v33  ;;  %v5339_v53 = vmax.f32 %v5252_v44, %v1114_v38 }
 0x203   :  { %v2123_v56 = vpack.c.bf16 %v5330_v51, %v5317_v9  ;;  %v1214_v50 = vrot.slane %v5327_v49, 1  ;;  %v1645_v57 = vrot.slane %v5327_v49, 2  ;;  %v1898_v58 = vrot.slane %v5327_v49, 3 }
 0x204   :  { %v4332_v11 = vpop.permute.xlu1 %4331  ;;  %v1211_v44 = vrot.slane %v5336_v35, 1  ;;  %v1642_v60 = vrot.slane %v5336_v35, 2  ;;  %v1895_v63 = vrot.slane %v5336_v35, 3  ;;  %v2122_v0 = vpack.c.bf16 %v5339_v53, %v5321_v46 }
 0x205   :  { %v4334_v6 = vunpack.i.h.bf16 %v4332_v11  ;;  %v4333_v14 = vunpack.i.l.bf16 %v4332_v11  ;;  %v1215_v15 = vsel %vm998_vm1, %v1213_v47, %v1214_v50  ;;  %v5361_v17 = vsel %vm1640_vm5, %v1644_v48, %v1645_v57 }
 0x206   :  { %3773 = vmatprep.mubr.msk.bf16.mxu1 %vm1333_vm4, %v1215_v15  ;;  %v4337_v19 = vpop.permute.xlu0 %4336  ;;  %v1212_v20 = vsel %vm998_vm1, %v1210_v54, %v1211_v44  ;;  %v5366_v21 = vsel %vm1640_vm5, %v1641_v55, %v1642_v60  ;;  %v5371_v22 = vsel %vm1893_vm6, %v1897_v52, %v1898_v58  ;;  %v5387_v37 = vsel %vm1893_vm6, %v1894_v23, %v1895_v63 }
 0x207   :  { %v5375_v24 = vmax.f32 %v5268_v12, %v4334_v6  ;;  %v1115_v25 = vsel %vm1109_vm3, %v4333_v14, %v4334_v6  ;;  %v4339_v26 = vunpack.i.h.bf16 %v4337_v19  ;;  %v4338_v28 = vunpack.i.l.bf16 %v4337_v19  ;;  %1386 = vmatmul.mubr.bf16.vlgmr.msra.gmra.mrb[0].mxu1 %v1212_v20  ;;  %v4513_v14 = vld [vmem:[%s6292_s3 + $0x34] ss:$8 sps:$4 sm:$0xff]  }
 0x208   :  { %v5379_v30 = vmax.f32 %v5266_v62, %v1115_v25  ;;  %1548 = vmatpush1.bf16.msra.mxu1 %v4502_v59  ;;  %v4342_v31 = vpop.permute.xlu1 %4341 }
 0x209   :  { %v5391_v12 = vpack.c.bf16 %v5375_v24, %v5330_v51  ;;  %v5394_v39 = vmax.f32 %v5280_v13, %v4339_v26  ;;  %v1116_v62 = vsel %vm1109_vm3, %v4338_v28, %v4339_v26  ;;  %v4344_v45 = vunpack.i.h.bf16 %v4342_v31  ;;  %1549 = vmatprep.subr.bf16.mxu1 %v4507_v16 }
 0x20a   :  { %v5402_v41 = vpack.c.bf16 %v5379_v30, %v5339_v53  ;;  %v5405_v42 = vmax.f32 %v5272_v3, %v1116_v62  ;;  %v4343_v43 = vunpack.i.l.bf16 %v4342_v31  ;;  %v4508_v3 = vld [vmem:[%s6292_s3 + $0x20] ss:$8 sps:$4 sm:$0xff]  }
 0x20b   :  { %v5409_v13 = vpack.c.bf16 %v5394_v39, %v5394_v39  ;;  %v5412_v47 = vmax.f32 %v5276_v5, %v4344_v45  ;;  %v1218_v48 = vrot.slane %v5391_v12, 1  ;;  %v1649_v38 = vrot.slane %v5391_v12, 2 }
 0x20c   :  { %v1117_v52 = vsel %vm1109_vm3, %v4343_v43, %v4344_v45  ;;  %1550 = vmatpush1.bf16.msra.mxu1 %v4505_v1  ;;  %v1216_v54 = vrot.slane %v5402_v41, 1  ;;  %v5423_v55 = vpack.c.bf16 %v5405_v42, %v5405_v42  ;;  %v1647_v5 = vrot.slane %v5402_v41, 2 }
 0x20d   :  { %v5427_v11 = vmax.f32 %v5274_v4, %v1117_v52  ;;  %v1868_v59 = vpack.c.bf16 %v5412_v47, %v5394_v39  ;;  %v1219_v6 = vsel %vm998_vm1, %v1214_v50, %v1218_v48  ;;  %1551 = vmatprep.subr.bf16.mxu1 %v4510_v40  ;;  %v1222_v16 = vrot.slane %v5409_v13, 1 }
 0x20e   :  { %3774 = vmatprep.mubr.msk.bf16.mxu1 %vm1333_vm4, %v1219_v6  ;;  %v1217_v15 = vsel %vm998_vm1, %v1211_v44, %v1216_v54  ;;  %v5439_v19 = vsel %vm1640_vm5, %v1645_v57, %v1649_v38  ;;  %v5444_v20 = vsel %vm1640_vm5, %v1642_v60, %v1647_v5  ;;  %v1653_v50 = vrot.slane %v5409_v13, 2  ;;  %v4511_v44 = vld [vmem:[%s6292_s3 + $0x30] ss:$8 sps:$4 sm:$0xff]   ;;  %v4516_v60 = vld [vmem:[%s6292_s3 + $0x44] ss:$8 sps:$4 sm:$0xff]  }
 0x20f   :  { %v5441_v4 = vrot.slane %v1868_v59, 3  ;;  %1396 = vmatmul.mubr.bf16.gmra.mrb[4].mxu1 %v1217_v15  ;;  %v1651_v23 = vrot.slane %v5423_v55, 2  ;;  %v1223_v25 = vsel %vm998_vm1, %v1218_v48, %v1222_v16  ;;  %v1902_v57 = vrot.slane %v5391_v12, 3  ;;  %v4517_v59 = vld [vmem:[%s6292_s3 + $0x50] ss:$8 sps:$4 sm:$0xff]  }
 0x210   :  { %1552 = vmatpush1.bf16.msra.mxu1 %v4508_v3  ;;  %v1900_v26 = vrot.slane %v5402_v41, 3  ;;  %3775 = vmatprep.mubr.msk.bf16.mxu1 %vm1333_vm4, %v1223_v25  ;;  %v1220_v28 = vrot.slane %v5423_v55, 1  ;;  %v5462_v31 = vsel %vm1640_vm5, %v1649_v38, %v1653_v50  ;;  %v1867_v62 = vpack.c.bf16 %v5427_v11, %v5405_v42  ;;  %v4522_v6 = vld [vmem:[%s6292_s3 + $0x64] ss:$8 sps:$4 sm:$0xff]   ;;  %v4523_v15 = vld [vmem:[%s6292_s3 + $0x70] ss:$8 sps:$4 sm:$0xff]  }
 0x211   :  { %1553 = vmatprep.subr.bf16.mxu1 %v4513_v14  ;;  %v5467_v1 = vsel %vm1640_vm5, %v1647_v5, %v1651_v23  ;;  %v5474_v45 = vsel %vm1893_vm6, %v1898_v58, %v1902_v57  ;;  %v5483_v43 = vsel %vm1893_vm6, %v1902_v57, %v5441_v4  ;;  %v2125_v48 = vpack.c.bf16 %v5394_v39, %v5375_v24  ;;  %v4514_v58 = vld [vmem:[%s6292_s3 + $0x40] ss:$8 sps:$4 sm:$0xff]   ;;  %v4529_v57 = vld [vmem:[%s6292_s3 + $0x90] ss:$8 sps:$4 sm:$0xff]  }
 0x212   :  { %v5479_v40 = vsel %vm1893_vm6, %v1895_v63, %v1900_v26  ;;  %v5487_v38 = vrot.slane %v1867_v62, 3  ;;  %v2124_v52 = vpack.c.bf16 %v5405_v42, %v5379_v30  ;;  %v4519_v63 = vld [vmem:[%s6292_s3 + $0x54] ss:$8 sps:$4 sm:$0xff]   ;;  %v1221_v5 = vsel %vm998_vm1, %v1216_v54, %v1220_v28  ;;  %v4520_v14 = vld [vmem:[%s6292_s3 + $0x60] ss:$8 sps:$4 sm:$0xff]  }
 0x213   :  { %v4525_v54 = vld [vmem:[%s6292_s3 + $0x74] ss:$8 sps:$4 sm:$0xff]   ;;  %v4526_v25 = vld [vmem:[%s6292_s3 + $0x80] ss:$8 sps:$4 sm:$0xff]   ;;  %v2126_v32 = vpack.c.bf16 %v5427_v11, %v5427_v11 }
 0x214   :  { %1554 = vmatpush1.bf16.msra.mxu1 %v4511_v44  ;;  %v5499_v3 = vsel %vm1893_vm6, %v1900_v26, %v5487_v38  ;;  %v4531_v44 = vld [vmem:[%s6292_s3 + $0x94] ss:$8 sps:$4 sm:$0xff]   ;;  %v4633_v42 = vld [vmem:[%s6294_s5 + $0x48] sm:$0xff]  }
 0x215   :  { %1555 = vmatprep.subr.bf16.mxu1 %v4516_v60  ;;  %v4536_v62 = vld [vmem:[%s6292_s3 + $0x154] ss:$8 sps:$4 sm:$0xff]   ;;  %2672 = vmatpush1.bf16.msra.mxu0 %v4633_v42 }
 0x216   :  { %v4630_v30 = vld [vmem:[%s6294_s5 + $0x90] sm:$0xff]   ;;  %2673 = vmatprep.subr.bf16.mxu0 %v4713_v2 }
 0x217   :  { %1406 = vmatmul.mubr.bf16.gmra.mrb[8].mxu1 %v1221_v5  ;;  %v4537_v5 = vld [vmem:[%s6292_s3 + $0x160] ss:$8 sps:$4 sm:$0xff]   ;;  %v4635_v11 = vld [vmem:[%s6294_s5 + $0x50] sm:$0xff]  }
 0x218   :  { %1556 = vmatpush1.bf16.msra.mxu1 %v4514_v58  ;;  %3776 = vmatprep.mubr.msk.bf16.mxu1 %vm1333_vm4, %v1222_v16  ;;  %v4528_v16 = vld [vmem:[%s6292_s3 + $0x84] ss:$8 sps:$4 sm:$0xff]   ;;  %v4534_v58 = vld [vmem:[%s6292_s3 + $0x150] ss:$8 sps:$4 sm:$0xff]  }
 0x219   :  { %1557 = vmatprep.subr.bf16.mxu1 %v4519_v63  ;;  %v4539_v63 = vld [vmem:[%s6292_s3 + $0x164] ss:$8 sps:$4 sm:$0xff]   ;;  %2674 = vmatpush1.bf16.msra.mxu0 %v4635_v11 }
 0x21a   :  { %2675 = vmatprep.subr.bf16.mxu0 %v4713_v2 }
 0x21c   :  { %1558 = vmatpush1.bf16.msra.mxu1 %v4517_v59  ;;  %v4542_v59 = vld [vmem:[%s6292_s3 + $0x174] ss:$8 sps:$4 sm:$0xff]  }
 0x21d   :  { %1559 = vmatprep.subr.bf16.mxu1 %v4522_v6  ;;  %v4540_v6 = vld [vmem:[%s6292_s3 + $0x170] ss:$8 sps:$4 sm:$0xff]  }
 0x21f   :  { %1416 = vmatmul.mubr.bf16.gmra.mrb[12].mxu1 %v1220_v28 }
 0x220   :  { %1560 = vmatpush1.bf16.msra.mxu1 %v4520_v14  ;;  %3800 = vmatprep.mubr.msk.bf16.mxu1 %vm1333_vm4, %v5309_v36  ;;  %v1178_v36 = vld [vmem:[%s6292_s3 + $0xa0] sm:$0x11]  ;;  %v4548_v14 = vld [vmem:[%s6292_s3 + $0x194] ss:$8 sps:$4 sm:$0xff]  }
 0x221   :  { %1561 = vmatprep.subr.bf16.mxu1 %v4525_v54  ;;  %v3798_v26 = vcombine.high %v1178_v36, %v1178_v36  ;;  %v3797_v60 = vcombine.low %v1178_v36, %v1178_v36  ;;  %v4546_v54 = vld [vmem:[%s6292_s3 + $0x190] ss:$8 sps:$4 sm:$0xff]  }
 0x222   :  { %v4558_v36 = vld [vmem:[%s6292_s3 + $0x1d0] ss:$8 sps:$4 sm:$0xff]  }
 0x223   :  { %v1542_v28 = vsel %vm1346_vm2, %v3797_v60, 0 }
 0x224   :  { %1562 = vmatpush1.bf16.msra.mxu1 %v4523_v15  ;;  %v4554_v15 = vld [vmem:[%s6292_s3 + $0x1b4] ss:$8 sps:$4 sm:$0xff]  }
 0x225   :  { %1563 = vmatprep.subr.bf16.mxu1 %v4528_v16  ;;  %v4552_v16 = vld [vmem:[%s6292_s3 + $0x1b0] ss:$8 sps:$4 sm:$0xff]  }
 0x228   :  { %1564 = vmatpush1.bf16.msra.mxu1 %v4526_v25  ;;  %v4555_v25 = vld [vmem:[%s6292_s3 + $0x1c0] ss:$8 sps:$4 sm:$0xff]  }
 0x229   :  { %1565 = vmatprep.subr.bf16.mxu1 %v4531_v44  ;;  %v4560_v44 = vld [vmem:[%s6292_s3 + $0x1d4] ss:$8 sps:$4 sm:$0xff]  }
 0x22c   :  { %1566 = vmatpush1.bf16.msra.mxu1 %v4529_v57  ;;  %v4563_v57 = vld [vmem:[%s6292_s3 + $0x1e4] ss:$8 sps:$4 sm:$0xff]  }
 0x22d   :  { %3799 = vmatprep.subr.msk.bf16.mxu1 %vm1346_vm2, %v3798_v26  ;;  %v4561_v26 = vld [vmem:[%s6292_s3 + $0x1e0] ss:$8 sps:$4 sm:$0xff]  }
 0x230   :  { %1568 = vmatpush1.bf16.msra.mxu1 %v1542_v28 }
 0x231   :  { %1782 = vmatprep.subr.bf16.mxu1 %v4536_v62 }
 0x233   :  { %1580 = vmatmul.mubr.bf16.vlgmr.msra.gmra.mrb[0].mxu1 %v5314_v61  ;;  %v4545_v61 = vld [vmem:[%s6292_s3 + $0x184] ss:$8 sps:$4 sm:$0xff]  }
 0x234   :  { %3801 = vmatprep.mubr.msk.bf16.mxu1 %vm1333_vm4, %v5327_v49  ;;  %1783 = vmatpush1.bf16.msra.mxu1 %v4534_v58  ;;  %v4543_v49 = vld [vmem:[%s6292_s3 + $0x180] ss:$8 sps:$4 sm:$0xff]   ;;  %v4568_v58 = vld [vmem:[%s6292_s3 + $0x1fc] ss:$8 sps:$4 sm:$0xff]  }
 0x235   :  { %1784 = vmatprep.subr.bf16.mxu1 %v4539_v63  ;;  %v4566_v63 = vld [vmem:[%s6292_s3 + $0x1f8] ss:$8 sps:$4 sm:$0xff]  }
 0x238   :  { %1785 = vmatpush1.bf16.msra.mxu1 %v4537_v5  ;;  %v4571_v5 = vld [vmem:[%s6292_s3 + $0x20c] ss:$8 sps:$4 sm:$0xff]  }
 0x239   :  { %1786 = vmatprep.subr.bf16.mxu1 %v4542_v59  ;;  %v4569_v59 = vld [vmem:[%s6292_s3 + $0x208] ss:$8 sps:$4 sm:$0xff]  }
 0x23b   :  { %1590 = vmatmul.mubr.bf16.gmra.mrb[4].mxu1 %v5336_v35  ;;  %v4551_v35 = vld [vmem:[%s6292_s3 + $0x1a4] ss:$8 sps:$4 sm:$0xff]  }
 0x23c   :  { %3802 = vmatprep.mubr.msk.bf16.mxu1 %vm1333_vm4, %v5391_v12  ;;  %1787 = vmatpush1.bf16.msra.mxu1 %v4540_v6  ;;  %v4549_v12 = vld [vmem:[%s6292_s3 + $0x1a0] ss:$8 sps:$4 sm:$0xff]   ;;  %v4574_v6 = vld [vmem:[%s6292_s3 + $0x21c] ss:$8 sps:$4 sm:$0xff]  }
 0x23d   :  { %1788 = vmatprep.subr.bf16.mxu1 %v4545_v61  ;;  %v4572_v61 = vld [vmem:[%s6292_s3 + $0x218] ss:$8 sps:$4 sm:$0xff]  }
 0x240   :  { %1789 = vmatpush1.bf16.msra.mxu1 %v4543_v49  ;;  %v4580_v49 = vld [vmem:[%s6292_s3 + $0x23c] ss:$8 sps:$4 sm:$0xff]  }
 0x241   :  { %1790 = vmatprep.subr.bf16.mxu1 %v4548_v14  ;;  %v4578_v14 = vld [vmem:[%s6292_s3 + $0x238] ss:$8 sps:$4 sm:$0xff]  }
 0x243   :  { %1600 = vmatmul.mubr.bf16.gmra.mrb[8].mxu1 %v5402_v41  ;;  %v4557_v41 = vld [vmem:[%s6292_s3 + $0x1c4] ss:$8 sps:$4 sm:$0xff]  }
 0x244   :  { %3803 = vmatprep.mubr.msk.bf16.mxu1 %vm1333_vm4, %v5409_v13  ;;  %1791 = vmatpush1.bf16.msra.mxu1 %v4546_v54  ;;  %v4586_v54 = vld [vmem:[%s6292_s3 + $0x25c] ss:$8 sps:$4 sm:$0xff]   ;;  %v4589_v13 = vld [vmem:[%s6292_s3 + $0x26c] ss:$8 sps:$4 sm:$0xff]  }
 0x245   :  { %1792 = vmatprep.subr.bf16.mxu1 %v4551_v35  ;;  %v4584_v35 = vld [vmem:[%s6292_s3 + $0x258] ss:$8 sps:$4 sm:$0xff]  }
 0x248   :  { %1793 = vmatpush1.bf16.msra.mxu1 %v4549_v12  ;;  %v4590_v12 = vld [vmem:[%s6292_s3 + $0x278] ss:$8 sps:$4 sm:$0xff]  }
 0x249   :  { %1794 = vmatprep.subr.bf16.mxu1 %v4554_v15 }
 0x24b   :  { %1610 = vmatmul.mubr.bf16.gmra.mrb[16].mxu1 %v5423_v55  ;;  %v4595_v55 = vld [vmem:[%s6292_s3 + $0x28c] ss:$8 sps:$4 sm:$0xff]  }
 0x24c   :  { %1795 = vmatpush1.bf16.msra.mxu1 %v4552_v16  ;;  %3848 = vmatprep.mubr.msk.bf16.mxu1 %vm1333_vm4, %v5361_v17  ;;  %v3824_v17 = vld [vmem:[%s6292_s3 + $0x1f0] sm:$0x11] }
 0x24d   :  { %1796 = vmatprep.subr.bf16.mxu1 %v4557_v41  ;;  %v3846_v60 = vcombine.high %v3824_v17, %v3824_v17  ;;  %v3845_v28 = vcombine.low %v3824_v17, %v3824_v17  ;;  %v4606_v17 = vld [vmem:[%s6292_s3 + $0x2c4] ss:$8 sps:$4 sm:$0xff]  }
 0x24f   :  { %v1777_v62 = vsel %vm1346_vm2, %v3845_v28, 0  ;;  %v4610_v28 = vld [vmem:[%s6292_s3 + $0x2e0] ss:$8 sps:$4 sm:$0xff]  }
 0x250   :  { %1797 = vmatpush1.bf16.msra.mxu1 %v4555_v25  ;;  %v4600_v25 = vld [vmem:[%s6292_s3 + $0x2a4] ss:$8 sps:$4 sm:$0xff]  }
 0x251   :  { %1798 = vmatprep.subr.bf16.mxu1 %v4560_v44  ;;  %v4598_v44 = vld [vmem:[%s6292_s3 + $0x2a0] ss:$8 sps:$4 sm:$0xff]  }
 0x254   :  { %1799 = vmatpush1.bf16.msra.mxu1 %v4558_v36  ;;  %v4603_v36 = vld [vmem:[%s6292_s3 + $0x2b4] ss:$8 sps:$4 sm:$0xff]  }
 0x255   :  { %1800 = vmatprep.subr.bf16.mxu1 %v4563_v57  ;;  %v4601_v57 = vld [vmem:[%s6292_s3 + $0x2b0] ss:$8 sps:$4 sm:$0xff]  }
 0x258   :  { %1801 = vmatpush1.bf16.msra.mxu1 %v4561_v26  ;;  %v4604_v26 = vld [vmem:[%s6292_s3 + $0x2c0] ss:$8 sps:$4 sm:$0xff]  }
 0x259   :  { %3847 = vmatprep.subr.msk.bf16.mxu1 %vm1346_vm2, %v3846_v60  ;;  %v4612_v60 = vld [vmem:[%s6292_s3 + $0x2e4] ss:$8 sps:$4 sm:$0xff]  }
 0x25c   :  { %1803 = vmatpush1.bf16.msra.mxu1 %v1777_v62  ;;  %v4618_v62 = vld [vmem:[%s6292_s3 + $0x304] ss:$8 sps:$4 sm:$0xff]  }
 0x25d   :  { %2035 = vmatprep.subr.bf16.mxu1 %v4568_v58  ;;  %v4616_v58 = vld [vmem:[%s6292_s3 + $0x300] ss:$8 sps:$4 sm:$0xff]  }
 0x25f   :  { %1815 = vmatmul.mubr.bf16.vlgmr.msra.gmra.mrb[0].mxu1 %v5366_v21  ;;  %v4577_v21 = vld [vmem:[%s6292_s3 + $0x22c] ss:$8 sps:$4 sm:$0xff]  }
 0x260   :  { %3849 = vmatprep.mubr.msk.bf16.mxu1 %vm1333_vm4, %v5439_v19  ;;  %2036 = vmatpush1.bf16.msra.mxu1 %v4566_v63  ;;  %v4575_v19 = vld [vmem:[%s6292_s3 + $0x228] ss:$8 sps:$4 sm:$0xff]   ;;  %v4624_v63 = vld [vmem:[%s6292_s3 + $0x324] ss:$8 sps:$4 sm:$0xff]  }
 0x261   :  { %2037 = vmatprep.subr.bf16.mxu1 %v4571_v5  ;;  %v3942_v5 = vcombine.high %v3920_v29, %v3920_v29 }
 0x264   :  { %2038 = vmatpush1.bf16.msra.mxu1 %v4569_v59  ;;  %v3941_v59 = vcombine.low %v3920_v29, %v3920_v29 }
 0x265   :  { %2039 = vmatprep.subr.bf16.mxu1 %v4574_v6 }
 0x266   :  { %v2268_v6 = vsel %vm1346_vm2, %v3941_v59, 0 }
 0x267   :  { %1825 = vmatmul.mubr.bf16.gmra.mrb[4].mxu1 %v5444_v20  ;;  %v4583_v20 = vld [vmem:[%s6292_s3 + $0x24c] ss:$8 sps:$4 sm:$0xff]  }
 0x268   :  { %3850 = vmatprep.mubr.msk.bf16.mxu1 %vm1333_vm4, %v5462_v31  ;;  %2040 = vmatpush1.bf16.msra.mxu1 %v4572_v61  ;;  %v4581_v31 = vld [vmem:[%s6292_s3 + $0x248] ss:$8 sps:$4 sm:$0xff]   ;;  %v2127_v61 = vpack.c.bf16 %v5412_v47, %v5412_v47  ;;  %v4631_v47 = vld [vmem:[%s6294_s5 + $0x98] sm:$0xff]  }
 0x269   :  { %2041 = vmatprep.subr.bf16.mxu1 %v4577_v21  ;;  %v4634_v21 = vld [vmem:[%s6294_s5 + $0xa8] sm:$0xff]  }
 0x26c   :  { %2042 = vmatpush1.bf16.msra.mxu1 %v4575_v19  ;;  %v4636_v19 = vld [vmem:[%s6294_s5 + $0xb0] sm:$0xff]  }
 0x26d   :  { %2043 = vmatprep.subr.bf16.mxu1 %v4580_v49  ;;  %v4638_v49 = vld [vmem:[%s6294_s5 + $0xb8] sm:$0xff]  }
 0x26f   :  { %1835 = vmatmul.mubr.bf16.gmra.mrb[8].mxu1 %v5467_v1  ;;  %v4592_v1 = vld [vmem:[%s6292_s3 + $0x27c] ss:$8 sps:$4 sm:$0xff]  }
 0x270   :  { %3851 = vmatprep.mubr.msk.bf16.mxu1 %vm1333_vm4, %v1653_v50  ;;  %2044 = vmatpush1.bf16.msra.mxu1 %v4578_v14  ;;  %v4587_v50 = vld [vmem:[%s6292_s3 + $0x268] ss:$8 sps:$4 sm:$0xff]  }
 0x271   :  { %2045 = vmatprep.subr.bf16.mxu1 %v4583_v20 }
 0x274   :  { %2046 = vmatpush1.bf16.msra.mxu1 %v4581_v31 }
 0x275   :  { %2047 = vmatprep.subr.bf16.mxu1 %v4586_v54 }
 0x277   :  { %1845 = vmatmul.mubr.bf16.gmra.mrb[20].mxu1 %v1651_v23  ;;  %v4593_v23 = vld [vmem:[%s6292_s3 + $0x288] ss:$8 sps:$4 sm:$0xff]  }
 0x278   :  { %2048 = vmatpush1.bf16.msra.mxu1 %v4584_v35  ;;  %3896 = vmatprep.mubr.msk.bf16.mxu1 %vm1333_vm4, %v5371_v22  ;;  %v3872_v22 = vld [vmem:[%s6292_s3 + $0x298] sm:$0x11] }
 0x279   :  { %2049 = vmatprep.subr.bf16.mxu1 %v4589_v13  ;;  %v3894_v15 = vcombine.high %v3872_v22, %v3872_v22  ;;  %v3893_v16 = vcombine.low %v3872_v22, %v3872_v22 }
 0x27b   :  { %v2030_v41 = vsel %vm1346_vm2, %v3893_v16, 0 }
 0x27c   :  { %2050 = vmatpush1.bf16.msra.mxu1 %v4587_v50 }
 0x27d   :  { %2051 = vmatprep.subr.bf16.mxu1 %v4592_v1 }
 0x280   :  { %2052 = vmatpush1.bf16.msra.mxu1 %v4590_v12 }
 0x281   :  { %2053 = vmatprep.subr.bf16.mxu1 %v4595_v55 }
 0x284   :  { %2054 = vmatpush1.bf16.msra.mxu1 %v4593_v23 }
 0x285   :  { %3895 = vmatprep.subr.msk.bf16.mxu1 %vm1346_vm2, %v3894_v15  ;;  %v2358_v15 = vld [vmem:[%s6293_s4] sm:$0x3] }
 0x286   :  { %v5840_v16 = vrot.slane %v2358_v15, %v942_v8 }
 0x288   :  { %2056 = vmatpush1.bf16.msra.mxu1 %v2030_v41  ;;  %v5844_v41 = vrot.slane %v2358_v15, %v946_v10  ;;  %v4640_v10 = vld [vmem:[%s6294_s5 + $0xc0] sm:$0xff]  }
 0x289   :  { %2273 = vmatprep.subr.bf16.mxu1 %v4600_v25 }
 0x28b   :  { %2068 = vmatmul.mubr.bf16.vlgmr.msra.gmra.mrb[0].mxu1 %v5387_v37  ;;  %v4609_v37 = vld [vmem:[%s6292_s3 + $0x2d4] ss:$8 sps:$4 sm:$0xff]  }
 0x28c   :  { %3897 = vmatprep.mubr.msk.bf16.mxu1 %vm1333_vm4, %v5474_v45  ;;  %2274 = vmatpush1.bf16.msra.mxu1 %v4598_v44  ;;  %v4607_v45 = vld [vmem:[%s6292_s3 + $0x2d0] ss:$8 sps:$4 sm:$0xff]  }
 0x28d   :  { %2275 = vmatprep.subr.bf16.mxu1 %v4603_v36 }
 0x290   :  { %2276 = vmatpush1.bf16.msra.mxu1 %v4601_v57 }
 0x291   :  { %2277 = vmatprep.subr.bf16.mxu1 %v4606_v17 }
 0x293   :  { %2078 = vmatmul.mubr.bf16.gmra.mrb[4].mxu1 %v5479_v40  ;;  %v4615_v40 = vld [vmem:[%s6292_s3 + $0x2f4] ss:$8 sps:$4 sm:$0xff]  }
 0x294   :  { %3898 = vmatprep.mubr.msk.bf16.mxu1 %vm1333_vm4, %v5483_v43  ;;  %2278 = vmatpush1.bf16.msra.mxu1 %v4604_v26  ;;  %v4613_v43 = vld [vmem:[%s6292_s3 + $0x2f0] ss:$8 sps:$4 sm:$0xff]  }
 0x295   :  { %2279 = vmatprep.subr.bf16.mxu1 %v4609_v37 }
 0x298   :  { %2280 = vmatpush1.bf16.msra.mxu1 %v4607_v45 }
 0x299   :  { %2281 = vmatprep.subr.bf16.mxu1 %v4612_v60 }
 0x29b   :  { %2088 = vmatmul.mubr.bf16.gmra.mrb[8].mxu1 %v5499_v3  ;;  %v4619_v3 = vld [vmem:[%s6292_s3 + $0x310] ss:$8 sps:$4 sm:$0xff]  }
 0x29c   :  { %3899 = vmatprep.mubr.msk.bf16.mxu1 %vm1333_vm4, %v5441_v4  ;;  %2282 = vmatpush1.bf16.msra.mxu1 %v4610_v28  ;;  %v4621_v4 = vld [vmem:[%s6292_s3 + $0x314] ss:$8 sps:$4 sm:$0xff]  }
 0x29d   :  { %2283 = vmatprep.subr.bf16.mxu1 %v4615_v40 }
 0x2a0   :  { %2284 = vmatpush1.bf16.msra.mxu1 %v4613_v43 }
 0x2a1   :  { %2285 = vmatprep.subr.bf16.mxu1 %v4618_v62 }
 0x2a3   :  { %2098 = vmatmul.mubr.bf16.gmra.mrb[24].mxu1 %v5487_v38  ;;  %v4622_v38 = vld [vmem:[%s6292_s3 + $0x320] ss:$8 sps:$4 sm:$0xff]  }
 0x2a4   :  { %2286 = vmatpush1.bf16.msra.mxu1 %v4616_v58  ;;  %3944 = vmatprep.mubr.msk.bf16.mxu1 %vm1333_vm4, %v2121_v34  ;;  %v4625_v34 = vld [vmem:[%s6292_s3 + $0x330] ss:$8 sps:$4 sm:$0xff]   ;;  %v4641_v58 = vld [vmem:[%s6294_s5 + $0x68] sm:$0xff]  }
 0x2a5   :  { %2287 = vmatprep.subr.bf16.mxu1 %v4621_v4 }
 0x2a8   :  { %2288 = vmatpush1.bf16.msra.mxu1 %v4619_v3 }
 0x2a9   :  { %2289 = vmatprep.subr.bf16.mxu1 %v4624_v63 }
 0x2ac   :  { %2290 = vmatpush1.bf16.msra.mxu1 %v4622_v38 }
 0x2ad   :  { %2291 = vmatprep.subr.bf16.mxu1 %v4627_v27 }
 0x2b0   :  { %2292 = vmatpush1.bf16.msra.mxu1 %v4625_v34 }
 0x2b1   :  { %3943 = vmatprep.subr.msk.bf16.mxu1 %vm1346_vm2, %v3942_v5 }
 0x2b4   :  { %2294 = vmatpush1.bf16.msra.mxu1 %v2268_v6 }
 0x2b5   :  { %2934 = vmatprep.subr.bf16.mxu1 %v4713_v2 }
 0x2b7   :  { %2306 = vmatmul.mubr.bf16.vlgmr.msra.gmra.mrb[0].mxu1 %v2120_v18 }
 0x2b8   :  { %3945 = vmatprep.mubr.msk.bf16.mxu1 %vm1333_vm4, %v2123_v56  ;;  %2935 = vmatpush1.bf16.msra.mxu1 %v4630_v30  ;;  %v4643_v30 = vld [vmem:[%s6294_s5 + $0x70] sm:$0xff]  }
 0x2b9   :  { %2936 = vmatprep.subr.bf16.mxu1 %v4713_v2 }
 0x2bc   :  { %2937 = vmatpush1.bf16.msra.mxu1 %v4631_v47 }
 0x2bd   :  { %2938 = vmatprep.subr.bf16.mxu1 %v4713_v2 }
 0x2bf   :  { %2316 = vmatmul.mubr.bf16.gmra.mrb[4].mxu1 %v2122_v0 }
 0x2c0   :  { %3946 = vmatprep.mubr.msk.bf16.mxu1 %vm1333_vm4, %v2125_v48  ;;  %v4632_v48 = vld [vmem:[%s6294_s5 + $0xa0] sm:$0xff]  }
 0x2c1   :  { %2939 = vmatpush1.bf16.msra.mxu1 %v4632_v48 }
 0x2c2   :  { %2940 = vmatprep.subr.bf16.mxu1 %v4713_v2 }
 0x2c5   :  { %2941 = vmatpush1.bf16.msra.mxu1 %v4634_v21 }
 0x2c6   :  { %2942 = vmatprep.subr.bf16.mxu1 %v4713_v2 }
 0x2c7   :  { %2326 = vmatmul.mubr.bf16.gmra.mrb[8].mxu1 %v2124_v52  ;;  %v4637_v52 = vld [vmem:[%s6294_s5 + $0x58] sm:$0xff]  }
 0x2c8   :  { %3947 = vmatprep.mubr.msk.bf16.mxu1 %vm1333_vm4, %v2127_v61  ;;  %2676 = vmatpush1.bf16.msra.mxu0 %v4637_v52 }
 0x2c9   :  { %2677 = vmatprep.subr.bf16.mxu0 %v4713_v2  ;;  %2943 = vmatpush1.bf16.msra.mxu1 %v4636_v19  ;;  %v4644_v19 = vld [vmem:[%s6294_s5 + $0xd0] sm:$0xff]  }
 0x2ca   :  { %2944 = vmatprep.subr.bf16.mxu1 %v4713_v2 }
 0x2cc   :  { %2678 = vmatpush1.bf16.msra.mxu0 %v4639_v7 }
 0x2cd   :  { %2945 = vmatpush1.bf16.msra.mxu1 %v4638_v49  ;;  %2679 = vmatprep.subr.bf16.mxu0 %v4713_v2  ;;  %v4645_v49 = vld [vmem:[%s6294_s5 + $0x78] sm:$0xff]  }
 0x2ce   :  { %2946 = vmatprep.subr.bf16.mxu1 %v4713_v2 }
 0x2cf   :  { %2336 = vmatmul.mubr.bf16.gmra.mrb[28].mxu1 %v2126_v32 }
 0x2d0   :  { %2680 = vmatpush1.bf16.msra.mxu0 %v4641_v58  ;;  %v4649_v58 = vld [vmem:[%s6294_s5 + $0x88] sm:$0xff]  }
 0x2d1   :  { %2947 = vmatpush1.bf16.msra.mxu1 %v4640_v10  ;;  %2681 = vmatprep.subr.bf16.mxu0 %v4713_v2 }
 0x2d2   :  { %2948 = vmatprep.subr.bf16.mxu1 %v4713_v2 }
 0x2d4   :  { %2682 = vmatpush1.bf16.msra.mxu0 %v4643_v30 }
 0x2d5   :  { %2683 = vmatprep.subr.bf16.mxu0 %v4713_v2 }
 0x2d8   :  { %2684 = vmatpush1.bf16.msra.mxu0 %v4645_v49 }
 0x2d9   :  { %2685 = vmatprep.subr.bf16.mxu0 %v4713_v2 }
 0x2f2   :  { %v1417_v33 = vpop.f32.mrb[12].mxu1 }
 0x2f3   :  { %v1419_v18 = vpop.f32.mrb[13].mxu1 }
 0x2f4   :  { %v1421_v9 = vpop.f32.mrb[14].mxu1 }
 0x2f5   :  { %v1422_v46 = vpop.f32.mrb[15].mxu1 }
 0x31e   :  { %v1611_v51 = vpop.f32.mrb[16].mxu1 }
 0x31f   :  { %v1612_v53 = vadd.f32 %v1611_v51, %v1417_v33  ;;  %v1613_v56 = vpop.f32.mrb[17].mxu1 }
 0x320   :  { %v1614_v0 = vadd.f32 %v1613_v56, %v1419_v18  ;;  %v1615_v24 = vpop.f32.mrb[18].mxu1 }
 0x321   :  { %v1616_v39 = vpop.f32.mrb[19].mxu1 }
 0x34a   :  { %v1846_v14 = vpop.f32.mrb[20].mxu1 }
 0x34b   :  { %v1865_v20 = vadd.f32 %v1846_v14, %v1612_v53  ;;  %v1848_v31 = vpop.f32.mrb[21].mxu1 }
 0x34c   :  { %v1866_v54 = vadd.f32 %v1848_v31, %v1614_v0  ;;  %v1850_v35 = vpop.f32.mrb[22].mxu1  ;;  %v4642_v0 = vld [vmem:[%s6294_s5 + $0xc8] sm:$0xff]  }
 0x34d   :  { %v1851_v13 = vpop.f32.mrb[23].mxu1  ;;  %2949 = vmatpush1.bf16.msra.mxu1 %v4642_v0 }
 0x34e   :  { %2950 = vmatprep.subr.bf16.mxu1 %v4713_v2 }
 0x351   :  { %2951 = vmatpush1.bf16.msra.mxu1 %v4644_v19 }
 0x352   :  { %3240 = vmatprep.subr.bf16.mxu1 %v4713_v2 }
 0x376   :  { %v2099_v50 = vpop.f32.mrb[24].mxu1 }
 0x377   :  { %v5831_v1 = vadd.f32 %v2099_v50, %v1865_v20  ;;  %v2101_v12 = vpop.f32.mrb[25].mxu1 }
 0x378   :  { %v5833_v55 = vadd.f32 %v2101_v12, %v1866_v54  ;;  %v2103_v22 = vpop.f32.mrb[26].mxu1 }
 0x379   :  { %v2104_v23 = vpop.f32.mrb[27].mxu1 }
 0x38a   :  { %v2307_v25 = vpop.f32.mrb[0].mxu1 }
 0x38b   :  { %v2370_v44 = vadd.f32 %v5840_v16, %v2307_v25  ;;  %v2309_v36 = vpop.f32.mrb[1].mxu1 }
 0x38c   :  { %v2371_v57 = vadd.f32 %v5844_v41, %v2309_v36  ;;  %v2311_v17 = vpop.f32.mrb[2].mxu1 }
 0x38d   :  { %v2384_v26 = vmax.f32 %v2370_v44, 0.0  ;;  %v2372_v37 = vadd.f32 %v5840_v16, %v2311_v17  ;;  %v2313_v45 = vpop.f32.mrb[3].mxu1 }
 0x38e   :  { %v2385_v60 = vmax.f32 %v2371_v57, 0.0  ;;  %v2373_v28 = vadd.f32 %v5844_v41, %v2313_v45 }
 0x38f   :  { %v2386_v8 = vmax.f32 %v2372_v37, 0.0  ;;  %v2413_v43 = vrot.slane %v2384_v26, 2 }
 0x390   :  { %v2387_v40 = vmax.f32 %v2373_v28, 0.0  ;;  %v2416_v4 = vrot.slane %v2385_v60, 2  ;;  %v4647_v28 = vld [vmem:[%s6294_s5 + $0x80] sm:$0xff]  }
 0x391   :  { %v2414_v62 = vrot.slane %v2386_v8, 2  ;;  %2686 = vmatpush1.bf16.msra.mxu0 %v4647_v28 }
 0x392   :  { %v2417_v3 = vrot.slane %v2387_v40, 2  ;;  %v2317_v63 = vpop.f32.mrb[4].mxu1  ;;  %2687 = vmatprep.subr.bf16.mxu0 %v4713_v2 }
 0x393   :  { %v2374_v38 = vadd.f32 %v5840_v16, %v2317_v63  ;;  %v2319_v27 = vpop.f32.mrb[5].mxu1  ;;  %v2415_v29 = vsel %vm1640_vm5, %v2413_v43, %v2414_v62 }
 0x394   :  { %v2375_v34 = vadd.f32 %v5844_v41, %v2319_v27  ;;  %v2321_v5 = vpop.f32.mrb[6].mxu1  ;;  %v2418_v59 = vsel %vm1640_vm5, %v2416_v4, %v2417_v3  ;;  %v5865_v6 = vmax.f32 %v2384_v26, %v2415_v29 }
 0x395   :  { %v2388_v61 = vmax.f32 %v2374_v38, 0.0  ;;  %v2376_v32 = vadd.f32 %v5840_v16, %v2321_v5  ;;  %v2323_v33 = vpop.f32.mrb[7].mxu1  ;;  %v5868_v18 = vmax.f32 %v2385_v60, %v2418_v59  ;;  %2688 = vmatpush1.bf16.msra.mxu0 %v4649_v58 }
 0x396   :  { %v2389_v9 = vmax.f32 %v2375_v34, 0.0  ;;  %v2377_v46 = vadd.f32 %v5844_v41, %v2323_v33  ;;  %2790 = vmatprep.subr.bf16.mxu0 %v4713_v2 }
 0x397   :  { %v2419_v51 = vrot.slane %v2388_v61, 2  ;;  %v2390_v53 = vmax.f32 %v2376_v32, 0.0  ;;  %v4345_v56 = vpack.i.bf16 %v5868_v18, %v5865_v6 }
 0x398   :  { %v2421_v24 = vrot.slane %v2389_v9, 2  ;;  %v2391_v39 = vmax.f32 %v2377_v46, 0.0 }
 0x399   :  { %v2423_v42 = vrot.slane %v2390_v53, 2  ;;  %4346 = vrot.lane.b32.xlu0 %v4345_v56, %s4715_s25  ;;  %v2420_v47 = vsel %vm1640_vm5, %v2414_v62, %v2419_v51 }
 0x39a   :  { %v2425_v11 = vrot.slane %v2391_v39, 2  ;;  %v2327_v48 = vpop.f32.mrb[8].mxu1  ;;  %v2422_v52 = vsel %vm1640_vm5, %v2417_v3, %v2421_v24  ;;  %v5883_v21 = vmax.f32 %v2386_v8, %v2420_v47 }
 0x39b   :  { %v2378_v14 = vadd.f32 %v5840_v16, %v2327_v48  ;;  %v2329_v20 = vpop.f32.mrb[9].mxu1  ;;  %v5893_v31 = vmax.f32 %v2387_v40, %v2422_v52  ;;  %v2424_v54 = vsel %vm1640_vm5, %v2419_v51, %v2423_v42 }
 0x39c   :  { %v2379_v35 = vadd.f32 %v5844_v41, %v2329_v20  ;;  %v2331_v13 = vpop.f32.mrb[10].mxu1  ;;  %v2426_v50 = vsel %vm1640_vm5, %v2421_v24, %v2425_v11  ;;  %v5899_v12 = vmax.f32 %v2388_v61, %v2424_v54 }
 0x39d   :  { %v2392_v22 = vmax.f32 %v2378_v14, 0.0  ;;  %v2380_v23 = vadd.f32 %v5840_v16, %v2331_v13  ;;  %v2333_v15 = vpop.f32.mrb[11].mxu1  ;;  %v4350_v25 = vpack.i.bf16 %v5893_v31, %v5883_v21  ;;  %v5904_v44 = vmax.f32 %v2389_v9, %v2426_v50 }
 0x39e   :  { %v2393_v36 = vmax.f32 %v2379_v35, 0.0  ;;  %v2381_v57 = vadd.f32 %v5844_v41, %v2333_v15 }
 0x39f   :  { %v2427_v17 = vrot.slane %v2392_v22, 2  ;;  %v2394_v26 = vmax.f32 %v2380_v23, 0.0  ;;  %4351 = vrot.lane.b32.xlu1 %v4350_v25, %s4715_s25  ;;  %v4355_v37 = vpack.i.bf16 %v5904_v44, %v5899_v12 }
 0x3a0   :  { %v2429_v45 = vrot.slane %v2393_v36, 2  ;;  %v2395_v60 = vmax.f32 %v2381_v57, 0.0  ;;  %v4646_v57 = vld [vmem:[%s6294_s5 + $0x120] sm:$0xff]  }
 0x3a1   :  { %v2431_v8 = vrot.slane %v2394_v26, 2  ;;  %4356 = vrot.lane.b32.xlu0 %v4355_v37, %s4715_s25  ;;  %v2428_v7 = vsel %vm1640_vm5, %v2423_v42, %v2427_v17 }
 0x3a2   :  { %v2433_v10 = vrot.slane %v2395_v60, 2  ;;  %v2337_v40 = vpop.f32.mrb[28].mxu1  ;;  %v2430_v43 = vsel %vm1640_vm5, %v2425_v11, %v2429_v45  ;;  %v5918_v62 = vmax.f32 %v2390_v53, %v2428_v7 }
 0x3a3   :  { %v2356_v4 = vadd.f32 %v2337_v40, %v5831_v1  ;;  %v2339_v3 = vpop.f32.mrb[29].mxu1  ;;  %v2460_v63 = vmax.f32 %v2391_v39, %v2430_v43  ;;  %v2432_v38 = vsel %vm1640_vm5, %v2427_v17, %v2431_v8 }
 0x3a4   :  { %v2357_v27 = vadd.f32 %v2339_v3, %v5833_v55  ;;  %v2341_v29 = vpop.f32.mrb[30].mxu1  ;;  %v2434_v34 = vsel %vm1640_vm5, %v2429_v45, %v2433_v10  ;;  %v5928_v5 = vmax.f32 %v2392_v22, %v2432_v38 }
 0x3a5   :  { %v2382_v59 = vadd.f32 %v5840_v16, %v2356_v4  ;;  %v2342_v61 = vpop.f32.mrb[31].mxu1  ;;  %v4360_v32 = vpack.i.bf16 %v2460_v63, %v5918_v62  ;;  %v2462_v33 = vmax.f32 %v2393_v36, %v2434_v34  ;;  %v4650_v29 = vld [vmem:[%s6294_s5 + $0x130] sm:$0xff]  }
 0x3a6   :  { %v2383_v1 = vadd.f32 %v5844_v41, %v2357_v27  ;;  %v4651_v61 = vld [vmem:[%s6294_s5] sm:$0xff]  }
 0x3a7   :  { %v2396_v9 = vmax.f32 %v2382_v59, 0.0  ;;  %4361 = vrot.lane.b32.xlu1 %v4360_v32, %s4715_s25  ;;  %v4365_v46 = vpack.i.bf16 %v2462_v33, %v5928_v5 }
 0x3a8   :  { %v2397_v55 = vmax.f32 %v2383_v1, 0.0 }
 0x3a9   :  { %v2435_v51 = vrot.slane %v2396_v9, 2  ;;  %4366 = vrot.lane.b32.xlu0 %v4365_v46, %s4715_s25 }
 0x3aa   :  { %v2437_v53 = vrot.slane %v2397_v55, 2 }
 0x3ab   :  { %v5937_v16 = vmax.f32 %v2396_v9, %v2435_v51  ;;  %v2436_v56 = vsel %vm1640_vm5, %v2431_v8, %v2435_v51 }
 0x3ac   :  { %v5940_v0 = vmax.f32 %v2397_v55, %v2437_v53  ;;  %v2438_v41 = vsel %vm1640_vm5, %v2433_v10, %v2437_v53  ;;  %v5943_v24 = vmax.f32 %v2394_v26, %v2436_v56 }
 0x3ad   :  { %v5945_v39 = vmax.f32 %v2395_v60, %v2438_v41  ;;  %v4652_v41 = vld [vmem:[%s6294_s5 + $0x138] sm:$0xff]  }
 0x3ae   :  { %v4375_v30 = vpack.i.bf16 %v5940_v0, %v5937_v16 }
 0x3af   :  { %v4370_v42 = vpack.i.bf16 %v5945_v39, %v5943_v24 }
 0x3b0   :  { %4376 = vrot.lane.b32.xlu0 %v4375_v30, %s4715_s25  ;;  %v4653_v30 = vld [vmem:[%s6294_s5 + $0x8] sm:$0xff]  }
 0x3b1   :  { %4371 = vrot.lane.b32.xlu1 %v4370_v42, %s4715_s25 }
 0x40b   :  { %v4347_v47 = vpop.permute.xlu0 %4346 }
 0x40c   :  { %v4349_v19 = vunpack.i.h.bf16 %v4347_v47  ;;  %v4348_v14 = vunpack.i.l.bf16 %v4347_v47 }
 0x40e   :  { %v2510_v25 = vsel %vm2509_vm7, %v4348_v14, %v4349_v19  ;;  %v2532_v17 = vmax.f32 %v5868_v18, %v4349_v19  ;;  %v4648_v18 = vld [vmem:[%s6294_s5 + $0x128] sm:$0xff]  }
 0x411   :  { %v4352_v11 = vpop.permute.xlu1 %4351 }
 0x412   :  { %v4354_v48 = vunpack.i.h.bf16 %v4352_v11  ;;  %v4353_v52 = vunpack.i.l.bf16 %v4352_v11 }
 0x413   :  { %v4357_v49 = vpop.permute.xlu0 %4356 }
 0x414   :  { %v2511_v20 = vsel %vm2509_vm7, %v4353_v52, %v4354_v48  ;;  %v4359_v54 = vunpack.i.h.bf16 %v4357_v49  ;;  %v4358_v35 = vunpack.i.l.bf16 %v4357_v49  ;;  %v2534_v13 = vmax.f32 %v5893_v31, %v4354_v48 }
 0x415   :  { %v2533_v23 = vmax.f32 %v5883_v21, %v2511_v20  ;;  %v2531_v21 = vmax.f32 %v5865_v6, %v2510_v25  ;;  %v4661_v25 = vld [vmem:[%s6294_s5 + $0x28] sm:$0xff]  }
 0x416   :  { %v2536_v50 = vmax.f32 %v5904_v44, %v4359_v54  ;;  %v2512_v22 = vsel %vm2509_vm7, %v4358_v35, %v4359_v54  ;;  %v4656_v35 = vld [vmem:[%s6294_s5 + $0x148] sm:$0xff]  }
 0x417   :  { %v2535_v15 = vmax.f32 %v5899_v12, %v2512_v22  ;;  %v5969_v12 = vpack.c.bf16 %v2534_v13, %v2532_v17  ;;  %v5975_v10 = vpack.c.bf16 %v2533_v23, %v2531_v21  ;;  %v4658_v22 = vld [vmem:[%s6294_s5 + $0x150] sm:$0xff]   ;;  %v4665_v21 = vld [vmem:[%s6294_s5 + $0x40] sm:$0xff]  }
 0x418   :  { %v5960_v36 = vpack.c.bf16 %v2536_v50, %v2534_v13  ;;  %v4657_v13 = vld [vmem:[%s6294_s5 + $0x18] sm:$0xff]   ;;  %v4663_v17 = vld [vmem:[%s6294_s5 + $0x30] sm:$0xff]  }
 0x419   :  { %v2846_v31 = vpack.c.bf16 %v2535_v15, %v2533_v23  ;;  %v4362_v26 = vpop.permute.xlu1 %4361  ;;  %v4659_v23 = vld [vmem:[%s6294_s5 + $0x20] sm:$0xff]  }
 0x41a   :  { %v4364_v44 = vunpack.i.h.bf16 %v4362_v26  ;;  %v4363_v37 = vunpack.i.l.bf16 %v4362_v26  ;;  %4017 = vmatprep.mubr.msk.bf16.mxu1 %vm2661_vm8, %v5960_v36  ;;  %v4664_v26 = vld [vmem:[%s6294_s5 + $0x38] sm:$0xff]  }
 0x41b   :  { %2967 = vmatmul.mubr.bf16.vlgmr.msra.gmra.mrb[32].mxu1 %v2846_v31  ;;  %v4367_v45 = vpop.permute.xlu0 %4366  ;;  %v3020_v42 = vrot.slane %v2846_v31, 2 }
 0x41c   :  { %v2538_v60 = vmax.f32 %v2460_v63, %v4364_v44  ;;  %v2513_v28 = vsel %vm2509_vm7, %v4363_v37, %v4364_v44  ;;  %3241 = vmatpush1.bf16.msra.mxu1 %v4646_v57  ;;  %v4369_v8 = vunpack.i.h.bf16 %v4367_v45  ;;  %v4368_v7 = vunpack.i.l.bf16 %v4367_v45  ;;  %v4662_v57 = vld [vmem:[%s6294_s5 + $0x160] sm:$0xff]  }
 0x41d   :  { %3242 = vmatprep.subr.bf16.mxu1 %v4713_v2  ;;  %v2537_v6 = vmax.f32 %v5918_v62, %v2513_v28  ;;  %v2597_v63 = vrot.slane %v5969_v12, 2  ;;  %v4666_v28 = vld [vmem:[%s6294_s5 + $0xd8] sm:$0xff]  }
 0x41e   :  { %v5979_v40 = vpack.c.bf16 %v2538_v60, %v2536_v50  ;;  %v5981_v43 = vmax.f32 %v2462_v33, %v4369_v8  ;;  %v2514_v58 = vsel %vm2509_vm7, %v4368_v7, %v4369_v8 }
 0x41f   :  { %v5985_v4 = vmax.f32 %v5928_v5, %v2514_v58  ;;  %v5987_v3 = vpack.c.bf16 %v2537_v6, %v2535_v15  ;;  %v2594_v5 = vrot.slane %v5975_v10, 2  ;;  %v4660_v15 = vld [vmem:[%s6294_s5 + $0x158] sm:$0xff]   ;;  %v3023_v58 = vrot.slane %v5960_v36, 2  ;;  %v4672_v36 = vld [vmem:[%s6294_s5 + $0x108] sm:$0xff]  }
 0x420   :  { %v5992_v38 = vpack.c.bf16 %v5981_v43, %v5981_v43  ;;  %3243 = vmatpush1.bf16.msra.mxu1 %v4648_v18  ;;  %v5995_v62 = vpack.c.bf16 %v5981_v43, %v2538_v60  ;;  %v2598_v27 = vrot.slane %v5979_v40, 2 }
 0x421   :  { %3244 = vmatprep.subr.bf16.mxu1 %v4713_v2  ;;  %v2848_v34 = vpack.c.bf16 %v5985_v4, %v2537_v6  ;;  %v2595_v59 = vrot.slane %v5987_v3, 2  ;;  %v6016_v55 = vpack.c.bf16 %v5985_v4, %v5985_v4 }
 0x422   :  { %4018 = vmatprep.mubr.msk.bf16.mxu1 %vm2661_vm8, %v5995_v62  ;;  %v2599_v32 = vsel %vm1640_vm5, %v2597_v63, %v2598_v27  ;;  %v2602_v33 = vrot.slane %v5992_v38, 2  ;;  %v4377_v31 = vpop.permute.xlu0 %4376  ;;  %v4673_v63 = vld [vmem:[%s6294_s5 + $0x110] sm:$0xff]  }
 0x423   :  { %3975 = vmatprep.mubr.msk.bf16.mxu0 %vm2661_vm8, %v2599_v32  ;;  %2975 = vmatmul.mubr.bf16.gmra.mrb[36].mxu1 %v2848_v34  ;;  %v3021_v1 = vrot.slane %v2848_v34, 2  ;;  %v4372_v9 = vpop.permute.xlu1 %4371  ;;  %v2596_v46 = vsel %vm1640_vm5, %v2594_v5, %v2595_v59  ;;  %v2600_v52 = vrot.slane %v6016_v55, 2  ;;  %v4379_v44 = vunpack.i.h.bf16 %v4377_v31  ;;  %v4676_v34 = vld [vmem:[%s6296_s7 + $0x8] sm:$0xff]   ;;  %v4677_v5 = vld [vmem:[%s6296_s7 + $0x10] sm:$0xff]  }
 0x424   :  { %3245 = vmatpush1.bf16.msra.mxu1 %v4650_v29  ;;  %v4374_v51 = vunpack.i.h.bf16 %v4372_v9  ;;  %v4373_v53 = vunpack.i.l.bf16 %v4372_v9  ;;  %2704 = vmatmul.mubr.bf16.vlgmr.msra.gmra.mrb[16].mxu0 %v2596_v46  ;;  %v2603_v56 = vsel %vm1640_vm5, %v2598_v27, %v2602_v33  ;;  %v4378_v45 = vunpack.i.l.bf16 %v4377_v31  ;;  %v4680_v32 = vld [vmem:[%s6296_s7 + $0x28] sm:$0xff]   ;;  %v6211_v46 = vld [vmem:[%s6298_s9] sm:$0xff]  }
 0x425   :  { %2791 = vmatpush1.bf16.msra.mxu0 %v4651_v61  ;;  %3976 = vmatprep.mubr.msk.bf16.mxu0 %vm2661_vm8, %v2603_v56  ;;  %v6035_v19 = vsel %vm1640_vm5, %v3020_v42, %v3021_v1  ;;  %v2601_v54 = vsel %vm1640_vm5, %v2595_v59, %v2600_v52  ;;  %v4716_v29 = vmov 0.0   ;;  %v4678_v59 = vld [vmem:[%s6296_s7 + $0x18] sm:$0xff]   ;;  %v4679_v61 = vld [vmem:[%s6296_s7 + $0x20] sm:$0xff]  }
 0x426   :  { %v2542_v47 = vmax.f32 %v5945_v39, %v4374_v51  ;;  %v2515_v11 = vsel %vm2509_vm7, %v4373_v53, %v4374_v51  ;;  %3246 = vmatprep.subr.bf16.mxu1 %v4713_v2  ;;  %2792 = vmatprep.subr.bf16.mxu0 %v4713_v2  ;;  %v4654_v39 = vld [vmem:[%s6294_s5 + $0x140] sm:$0xff]   ;;  %v2516_v7 = vsel %vm2509_vm7, %v4378_v45, %v4379_v44  ;;  %v6225_v51 = vld [vmem:[%s6298_s9 + $0x10] sm:$0xff]   ;;  %v6232_v53 = vld [vmem:[%s6298_s9 + $0x18] sm:$0xff]  }
 0x427   :  { %v6031_v48 = vmax.f32 %v5943_v24, %v2515_v11  ;;  %v4655_v24 = vld [vmem:[%s6294_s5 + $0x10] sm:$0xff]   ;;  %v2543_v18 = vmax.f32 %v5937_v16, %v2516_v7 }
 0x428   :  { %v6037_v49 = vpack.c.bf16 %v2542_v47, %v2542_v47  ;;  %3247 = vmatpush1.bf16.msra.mxu1 %v4652_v41  ;;  %v3158_v37 = vpack.c.bf16 %v2542_v47, %v5981_v43  ;;  %v4669_v16 = vld [vmem:[%s6294_s5 + $0xf0] sm:$0xff]   ;;  %v4670_v43 = vld [vmem:[%s6294_s5 + $0xf8] sm:$0xff]  }
 0x429   :  { %2793 = vmatpush1.bf16.msra.mxu0 %v4653_v30  ;;  %3248 = vmatprep.subr.bf16.mxu1 %v4713_v2  ;;  %v6045_v14 = vpack.c.bf16 %v6031_v48, %v6031_v48  ;;  %v3157_v60 = vpack.c.bf16 %v6031_v48, %v5985_v4  ;;  %v3159_v6 = vpack.c.bf16 %v2543_v18, %v2543_v18 }
 0x42a   :  { %4019 = vmatprep.mubr.msk.bf16.mxu1 %vm2661_vm8, %v6037_v49  ;;  %2794 = vmatprep.subr.bf16.mxu0 %v4713_v2 }
 0x42b   :  { %2983 = vmatmul.mubr.bf16.gmra.mrb[40].mxu1 %v6045_v14  ;;  %v3026_v20 = vrot.slane %v6045_v14, 2 }
 0x42c   :  { %3249 = vmatpush1.bf16.msra.mxu1 %v4654_v39  ;;  %2712 = vmatmul.mubr.bf16.gmra.mrb[20].mxu0 %v2601_v54 }
 0x42d   :  { %2795 = vmatpush1.bf16.msra.mxu0 %v4655_v24  ;;  %4077 = vmatprep.mubr.msk.bf16.mxu1 %vm2661_vm8, %v5979_v40  ;;  %v6067_v50 = vsel %vm1640_vm5, %v3021_v1, %v3026_v20  ;;  %v4682_v1 = vld [vmem:[%s6296_s7 + $0x38] ss:$0 sps:$4 sm:$0xff]  }
 0x42e   :  { %3977 = vmatprep.mubr.msk.bf16.mxu0 %vm2661_vm8, %v2602_v33  ;;  %3250 = vmatprep.subr.bf16.mxu1 %v4713_v2  ;;  %v4681_v33 = vld [vmem:[%s6296_s7 + $0x30] sm:$0xff]   ;;  %v3400_v9 = vsel %vm3398_vm9, %v4682_v1, 0 }
 0x42f   :  { %2796 = vmatprep.subr.bf16.mxu0 %v4713_v2 }
 0x430   :  { %3251 = vmatpush1.bf16.msra.mxu1 %v4656_v35 }
 0x431   :  { %2797 = vmatpush1.bf16.msra.mxu0 %v4657_v13  ;;  %3252 = vmatprep.subr.bf16.mxu1 %v4713_v2 }
 0x432   :  { %2798 = vmatprep.subr.bf16.mxu0 %v4713_v2 }
 0x434   :  { %3253 = vmatpush1.bf16.msra.mxu1 %v4658_v22  ;;  %2720 = vmatmul.mubr.bf16.gmra.mrb[24].mxu0 %v2600_v52 }
 0x435   :  { %2799 = vmatpush1.bf16.msra.mxu0 %v4659_v23  ;;  %3987 = vmatprep.mubr.msk.bf16.mxu0 %vm2661_vm8, %v5969_v12  ;;  %v2544_v12 = vmax.f32 %v5940_v0, %v4379_v44  ;;  %v4667_v0 = vld [vmem:[%s6294_s5 + $0xe0] sm:$0xff]  }
 0x436   :  { %3254 = vmatprep.subr.bf16.mxu1 %v4713_v2  ;;  %2800 = vmatprep.subr.bf16.mxu0 %v4713_v2 }
 0x437   :  { %v3160_v8 = vpack.c.bf16 %v2544_v12, %v2544_v12 }
 0x438   :  { %3255 = vmatpush1.bf16.msra.mxu1 %v4660_v15 }
 0x439   :  { %2801 = vmatpush1.bf16.msra.mxu0 %v4661_v25  ;;  %3256 = vmatprep.subr.bf16.mxu1 %v4713_v2 }
 0x43a   :  { %2802 = vmatprep.subr.bf16.mxu0 %v4713_v2 }
 0x43c   :  { %3257 = vmatpush1.bf16.msra.mxu1 %v4662_v57 }
 0x43d   :  { %2803 = vmatpush1.bf16.msra.mxu0 %v4663_v17  ;;  %4175 = vmatprep.subr.bf16.mxu1 %v4716_v29 }
 0x43e   :  { %2804 = vmatprep.subr.bf16.mxu0 %v4713_v2 }
 0x43f   :  { %3273 = vmatmul.mubr.bf16.vlgmr.msra.gmra.mrb[44].mxu1 %v5987_v3 }
 0x440   :  { %4078 = vmatprep.mubr.msk.bf16.mxu1 %vm2661_vm8, %v3158_v37  ;;  %4181 = vmatpush3.bf16.msra.mxu1 %v6211_v46 }
 0x441   :  { %2805 = vmatpush1.bf16.msra.mxu0 %v4664_v26  ;;  %4176 = vmatprep.subr.bf16.mxu1 %v4716_v29 }
 0x442   :  { %2806 = vmatprep.subr.bf16.mxu0 %v4713_v2 }
 0x445   :  { %2807 = vmatpush1.bf16.msra.mxu0 %v4665_v21 }
 0x446   :  { %3096 = vmatprep.subr.bf16.mxu0 %v4713_v2 }
 0x447   :  { %3281 = vmatmul.mubr.bf16.gmra.mrb[48].mxu1 %v3157_v60 }
 0x448   :  { %2823 = vmatmul.mubr.bf16.vlgmr.msra.gmra.mrb[28].mxu0 %v5975_v10  ;;  %4079 = vmatprep.mubr.msk.bf16.mxu1 %vm2661_vm8, %v3160_v8  ;;  %v4668_v10 = vld [vmem:[%s6294_s5 + $0xe8] sm:$0xff]  }
 0x449   :  { %3988 = vmatprep.mubr.msk.bf16.mxu0 %vm2661_vm8, %v5979_v40  ;;  %3097 = vmatpush1.bf16.msra.mxu0 %v4666_v28  ;;  %v3024_v40 = vrot.slane %v5995_v62, 2  ;;  %v3028_v62 = vrot.slane %v6037_v49, 2 }
 0x44a   :  { %3098 = vmatprep.subr.bf16.mxu0 %v4713_v2 }
 0x44b   :  { %v3025_v4 = vsel %vm1640_vm5, %v3023_v58, %v3024_v40  ;;  %v3029_v27 = vsel %vm1640_vm5, %v3024_v40, %v3028_v62 }
 0x44d   :  { %3099 = vmatpush1.bf16.msra.mxu0 %v4667_v0 }
 0x44e   :  { %3100 = vmatprep.subr.bf16.mxu0 %v4713_v2 }
 0x44f   :  { %3289 = vmatmul.mubr.bf16.gmra.mrb[52].mxu1 %v3159_v6 }
 0x450   :  { %2831 = vmatmul.mubr.bf16.gmra.mrb[32].mxu0 %v5987_v3  ;;  %v4671_v3 = vld [vmem:[%s6294_s5 + $0x100] sm:$0xff]   ;;  %4167 = vmatprep.mubr.msk.bf16.mxu1 %vm4717_vm10, %v4716_v29 }
 0x451   :  { %3989 = vmatprep.mubr.msk.bf16.mxu0 %vm2661_vm8, %v5992_v38  ;;  %3101 = vmatpush1.bf16.msra.mxu0 %v4668_v10  ;;  %v4674_v38 = vld [vmem:[%s6294_s5 + $0x118] sm:$0xff]  }
 0x452   :  { %3102 = vmatprep.subr.bf16.mxu0 %v4713_v2 }
 0x455   :  { %3103 = vmatpush1.bf16.msra.mxu0 %v4669_v16 }
 0x456   :  { %3104 = vmatprep.subr.bf16.mxu0 %v4713_v2 }
 0x458   :  { %2839 = vmatmul.mubr.bf16.gmra.mrb[36].mxu0 %v6016_v55  ;;  %v6218_v55 = vld [vmem:[%s6298_s9 + $0x8] sm:$0xff]  }
 0x459   :  { %3105 = vmatpush1.bf16.msra.mxu0 %v4670_v43  ;;  %4047 = vmatprep.mubr.msk.bf16.mxu0 %vm2661_vm8, %v3025_v4 }
 0x45a   :  { %3106 = vmatprep.subr.bf16.mxu0 %v4713_v2  ;;  %4182 = vmatpush3.bf16.msra.mxu1 %v6218_v55 }
 0x45b   :  { %4177 = vmatprep.subr.bf16.mxu1 %v4716_v29 }
 0x45d   :  { %3107 = vmatpush1.bf16.msra.mxu0 %v4671_v3 }
 0x45e   :  { %3108 = vmatprep.subr.bf16.mxu0 %v4713_v2  ;;  %4183 = vmatpush3.bf16.msra.mxu1 %v6225_v51 }
 0x45f   :  { %4178 = vmatprep.subr.bf16.mxu1 %v4716_v29 }
 0x461   :  { %3109 = vmatpush1.bf16.msra.mxu0 %v4672_v36 }
 0x462   :  { %3110 = vmatprep.subr.bf16.mxu0 %v4713_v2  ;;  %4184 = vmatpush3.bf16.msra.mxu1 %v6232_v53 }
 0x463   :  { %4179 = vmatprep.subr.bf16.mxu1 %v4716_v29 }
 0x465   :  { %3111 = vmatpush1.bf16.msra.mxu0 %v4673_v63 }
 0x466   :  { %3112 = vmatprep.subr.bf16.mxu0 %v4713_v2  ;;  %v4675_v2 = vld [vmem:[%s6296_s7] sm:$0xff]  }
 0x469   :  { %3113 = vmatpush1.bf16.msra.mxu0 %v4674_v38 }
 0x46a   :  { %4123 = vmatprep.subr.bf16.mxu0 %v4716_v29 }
 0x46c   :  { %3129 = vmatmul.mubr.bf16.vlgmr.msra.gmra.mrb[40].mxu0 %v6035_v19 }
 0x46d   :  { %4048 = vmatprep.mubr.msk.bf16.mxu0 %vm2661_vm8, %v3029_v27  ;;  %4124 = vmatpush3.bf16.msra.mxu0 %v4675_v2 }
 0x46e   :  { %4125 = vmatprep.subr.bf16.mxu0 %v4716_v29 }
 0x471   :  { %4126 = vmatpush3.bf16.msra.mxu0 %v4676_v34 }
 0x472   :  { %4127 = vmatprep.subr.bf16.mxu0 %v4716_v29 }
 0x474   :  { %3137 = vmatmul.mubr.bf16.gmra.mrb[44].mxu0 %v6067_v50 }
 0x475   :  { %4049 = vmatprep.mubr.msk.bf16.mxu0 %vm2661_vm8, %v3028_v62  ;;  %4128 = vmatpush3.bf16.msra.mxu0 %v4677_v5 }
 0x476   :  { %4129 = vmatprep.subr.bf16.mxu0 %v4716_v29 }
 0x479   :  { %4130 = vmatpush3.bf16.msra.mxu0 %v4678_v59 }
 0x47a   :  { %4131 = vmatprep.subr.bf16.mxu0 %v4716_v29 }
 0x47c   :  { %3145 = vmatmul.mubr.bf16.gmra.mrb[48].mxu0 %v3026_v20 }
 0x47d   :  { %4132 = vmatpush3.bf16.msra.mxu0 %v4679_v61  ;;  %4139 = vmatprep.mubr.msk.bf16.mxu0 %vm4717_vm10, %v4716_v29 }
 0x47e   :  { %4133 = vmatprep.subr.bf16.mxu0 %v4716_v29 }
 0x481   :  { %4134 = vmatpush3.bf16.msra.mxu0 %v4680_v32 }
 0x482   :  { %4135 = vmatprep.subr.bf16.mxu0 %v4716_v29 }
 0x485   :  { %4136 = vmatpush3.bf16.msra.mxu0 %v4681_v33 }
 0x486   :  { %4137 = vmatprep.subr.bf16.mxu0 %v4716_v29 }
 0x489   :  { %4138 = vmatpush3.bf16.msra.mxu0 %v3400_v9 }
 0x48a   :  { %4151 = vmatprep.subr.bf16.mxu0 %v4716_v29 }
 0x4ee   :  { %v2968_v56 = vpop.f32.mrb[32].mxu1 }
 0x4ef   :  { %v2970_v41 = vpop.f32.mrb[33].mxu1 }
 0x4f0   :  { %v2971_v30 = vpop.f32.mrb[34].mxu1 }
 0x4f1   :  { %v2973_v42 = vpop.f32.mrb[35].mxu1 }
 0x4f6   :  { %v2976_v47 = vpop.f32.mrb[36].mxu1 }
 0x4f7   :  { %v2705_v11 = vpop.f32.mrb[16].mxu0  ;;  %v2978_v48 = vpop.f32.mrb[37].mxu1 }
 0x4f8   :  { %v2707_v52 = vpop.f32.mrb[17].mxu0  ;;  %v2979_v19 = vpop.f32.mrb[38].mxu1 }
 0x4f9   :  { %v2708_v49 = vpop.f32.mrb[18].mxu0  ;;  %v2981_v39 = vpop.f32.mrb[39].mxu1 }
 0x4fa   :  { %v2710_v14 = vpop.f32.mrb[19].mxu0 }
 0x4fe   :  { %v2984_v24 = vpop.f32.mrb[40].mxu1 }
 0x4ff   :  { %v2713_v20 = vpop.f32.mrb[20].mxu0  ;;  %v2986_v54 = vpop.f32.mrb[41].mxu1 }
 0x500   :  { %v2715_v35 = vpop.f32.mrb[21].mxu0  ;;  %v2987_v13 = vpop.f32.mrb[42].mxu1 }
 0x501   :  { %v2716_v50 = vpop.f32.mrb[22].mxu0  ;;  %v2988_v22 = vpop.f32.mrb[43].mxu1 }
 0x502   :  { %v2718_v23 = vpop.f32.mrb[23].mxu0 }
 0x507   :  { %v2721_v15 = vpop.f32.mrb[24].mxu0 }
 0x508   :  { %v2723_v25 = vpop.f32.mrb[25].mxu0 }
 0x509   :  { %v2724_v57 = vpop.f32.mrb[26].mxu0 }
 0x50a   :  { %v2725_v17 = vpop.f32.mrb[27].mxu0 }
 0x512   :  { %v3274_v31 = vpop.f32.mrb[44].mxu1 }
 0x513   :  { %v3276_v26 = vpop.f32.mrb[45].mxu1 }
 0x514   :  { %v3277_v44 = vpop.f32.mrb[46].mxu1 }
 0x515   :  { %v3279_v37 = vpop.f32.mrb[47].mxu1 }
 0x51a   :  { %v3282_v21 = vpop.f32.mrb[48].mxu1 }
 0x51b   :  { %v2824_v12 = vpop.f32.mrb[28].mxu0  ;;  %v3284_v45 = vpop.f32.mrb[49].mxu1 }
 0x51c   :  { %v2825_v60 = vadd.f32 %v2824_v12, %v2705_v11  ;;  %v2826_v28 = vpop.f32.mrb[29].mxu0  ;;  %v3285_v8 = vpop.f32.mrb[50].mxu1 }
 0x51d   :  { %v2827_v7 = vpop.f32.mrb[30].mxu0  ;;  %v3287_v0 = vpop.f32.mrb[51].mxu1 }
 0x51e   :  { %v2828_v18 = vadd.f32 %v2827_v7, %v2708_v49  ;;  %v2829_v6 = vpop.f32.mrb[31].mxu0  ;;  %v2990_v10 = vadd.f32 %v2968_v56, %v2825_v60  ;;  %v4081_v7 = vld [vmem:[%s6297_s8] ss:$0 sm:$0xff] }
 0x520   :  { %v2991_v16 = vadd.f32 %v2971_v30, %v2828_v18  ;;  %v4080_v30 = vld [vmem:[%s6295_s6] ss:$0 sm:$0xff] }
 0x522   :  { %v3290_v40 = vpop.f32.mrb[52].mxu1 }
 0x523   :  { %v2832_v43 = vpop.f32.mrb[32].mxu0  ;;  %v3292_v58 = vpop.f32.mrb[53].mxu1 }
 0x524   :  { %v2833_v4 = vadd.f32 %v2832_v43, %v2713_v20  ;;  %v2834_v3 = vpop.f32.mrb[33].mxu0  ;;  %v3293_v36 = vpop.f32.mrb[54].mxu1 }
 0x525   :  { %v2835_v63 = vpop.f32.mrb[34].mxu0  ;;  %v3294_v38 = vpop.f32.mrb[55].mxu1 }
 0x526   :  { %v2836_v62 = vadd.f32 %v2835_v63, %v2716_v50  ;;  %v2837_v27 = vpop.f32.mrb[35].mxu0  ;;  %v2992_v2 = vadd.f32 %v2976_v47, %v2833_v4 }
 0x528   :  { %v2993_v34 = vadd.f32 %v2979_v19, %v2836_v62 }
 0x52b   :  { %v2840_v5 = vpop.f32.mrb[36].mxu0 }
 0x52c   :  { %v2841_v59 = vadd.f32 %v2840_v5, %v2721_v15  ;;  %v2842_v61 = vpop.f32.mrb[37].mxu0 }
 0x52d   :  { %v2843_v32 = vpop.f32.mrb[38].mxu0 }
 0x52e   :  { %v2844_v33 = vpop.f32.mrb[39].mxu0  ;;  %v2994_v1 = vadd.f32 %v2984_v24, %v2841_v59 }
 0x53f   :  { %v3130_v9 = vpop.f32.mrb[40].mxu0 }
 0x540   :  { %v3152_v56 = vadd.f32 %v3130_v9, %v2990_v10  ;;  %v3132_v41 = vpop.f32.mrb[41].mxu0 }
 0x541   :  { %v3133_v42 = vpop.f32.mrb[42].mxu0  ;;  %v4093_v41 = vld [vmem:[%s6299_s10] ss:$0 sm:$0xff]  ;;  %s4689_s10 = scalar_lea.vmem %s3594_s21, 32 }
 0x542   :  { %v3296_v11 = vadd.f32 %v3274_v31, %v3152_v56  ;;  %v3153_v48 = vadd.f32 %v3133_v42, %v2991_v16  ;;  %v3135_v52 = vpop.f32.mrb[43].mxu0  ;;  %p4690_p0 = scmp.ne.s32.totalorder %s3594_s21, %s4689_s10  ;;  %p4695_p2 = scmp.lt.s32.totalorder %s4689_s10, %s4689_s10 }
 0x544   :  { %v3308_v49 = vadd.f32 %v4080_v30, %v3296_v11  ;;  %v3297_v47 = vadd.f32 %v3277_v44, %v3153_v48  ;;  %p4696_p3 = por %p4695_p2, %p4694_p1 }
 0x546   :  { %v3309_v19 = vadd.f32 %v4080_v30, %v3297_v47  ;;  %v3313_v14 = vmax.f32 %v3308_v49, 0.0  ;;  %p4697_p4 = pnand %p4696_p3, %p4690_p0 }
 0x547   :  { %v3138_v39 = vpop.f32.mrb[44].mxu0 }
 0x548   :  { %v3314_v20 = vmax.f32 %v3309_v19, 0.0  ;;  %v3154_v54 = vadd.f32 %v3138_v39, %v2992_v2  ;;  %v3140_v35 = vpop.f32.mrb[45].mxu0 }
 0x549   :  { %v3141_v24 = vpop.f32.mrb[46].mxu0 }
 0x54a   :  { %v3318_v13 = vpack.c.bf16 %v3314_v20, %v3313_v14  ;;  %v3298_v50 = vadd.f32 %v3282_v21, %v3154_v54  ;;  %v3155_v22 = vadd.f32 %v3141_v24, %v2993_v34  ;;  %v3143_v23 = vpop.f32.mrb[47].mxu0 }
 0x54c   :  { %v3310_v15 = vadd.f32 %v4080_v30, %v3298_v50  ;;  %v3299_v25 = vadd.f32 %v3285_v8, %v3155_v22  ;;  %4140 = vmatmul.mubr.msk.bf16.vlgmr.msra.gmra.mrb[52].mxu0 %vm3388_vm11, %v3318_v13 }
 0x54d   :  { %4143 = vmatprep.mubr.msk.bf16.mxu0 %vm4717_vm10, %v4716_v29  ;;  %4152 = vmatpush3.bf16.msra.mxu0 %v6211_v46 }
 0x54e   :  { %v3311_v57 = vadd.f32 %v4080_v30, %v3299_v25  ;;  %4153 = vmatprep.subr.bf16.mxu0 %v4716_v29  ;;  %v3315_v31 = vmax.f32 %v3310_v15, 0.0 }
 0x54f   :  { %v3146_v17 = vpop.f32.mrb[48].mxu0 }
 0x550   :  { %v3316_v26 = vmax.f32 %v3311_v57, 0.0  ;;  %v3156_v44 = vadd.f32 %v3146_v17, %v2994_v1  ;;  %v3148_v37 = vpop.f32.mrb[49].mxu0 }
 0x551   :  { %v3149_v21 = vpop.f32.mrb[50].mxu0  ;;  %4154 = vmatpush3.bf16.msra.mxu0 %v6218_v55  ;;  %v4687_v55 = vld [vmem:[%s6298_s9 + $0x20] sm:$0xff]  }
 0x552   :  { %v3319_v12 = vpack.c.bf16 %v3316_v26, %v3315_v31  ;;  %v3300_v45 = vadd.f32 %v3290_v40, %v3156_v44  ;;  %v3150_v60 = vpop.f32.mrb[51].mxu0  ;;  %4155 = vmatprep.subr.bf16.mxu0 %v4716_v29  ;;  %4185 = vmatpush3.bf16.msra.mxu1 %v4687_v55 }
 0x553   :  { %4180 = vmatprep.subr.bf16.mxu1 %v4716_v29 }
 0x554   :  { %v3312_v28 = vadd.f32 %v4080_v30, %v3300_v45  ;;  %4144 = vmatmul.mubr.msk.bf16.gmra.mrb[56].mxu0 %vm3388_vm11, %v3319_v12 }
 0x555   :  { %4147 = vmatprep.mubr.msk.bf16.mxu0 %vm4717_vm10, %v4716_v29  ;;  %4156 = vmatpush3.bf16.msra.mxu0 %v6225_v51  ;;  %v4688_v51 = vld [vmem:[%s6298_s9 + $0x28] ss:$0 sps:$4 sm:$0x33]  }
 0x556   :  { %v3317_v46 = vmax.f32 %v3312_v28, 0.0  ;;  %4157 = vmatprep.subr.bf16.mxu0 %v4716_v29 }
 0x558   :  { %v3320_v8 = vpack.c.bf16 %v3317_v46, %v3317_v46 }
 0x559   :  { %4158 = vmatpush3.bf16.msra.mxu0 %v6232_v53  ;;  %v3529_v53 = vsel %vm3527_vm12, %v4688_v51, 0 }
 0x55a   :  { %4159 = vmatprep.subr.bf16.mxu0 %v4716_v29  ;;  %4186 = vmatpush3.bf16.msra.mxu1 %v3529_v53 }
 0x55c   :  { %4148 = vmatmul.mubr.msk.bf16.gmra.mrb[60].mxu0 %vm3388_vm11, %v3320_v8 }
 0x55d   :  { %4163 = vmatprep.mubr.msk.bf16.mxu0 %vm4717_vm10, %v4716_v29  ;;  %4160 = vmatpush3.bf16.msra.mxu0 %v4687_v55 }
 0x55e   :  { %4161 = vmatprep.subr.bf16.mxu0 %v4716_v29 }
 0x561   :  { %4162 = vmatpush3.bf16.msra.mxu0 %v3529_v53 }
 0x61f   :  { %v3436_v0 = vpop.f32.mrb[52].mxu0 }
 0x620   :  { %v3437_v18 = vadd.f32 %v4081_v7, %v3436_v0  ;;  %v4141_v6 = vpop.f32.mrb[53].mxu0 }
 0x621   :  { %v3439_v10 = vpop.f32.mrb[54].mxu0 }
 0x622   :  { %v3440_v16 = vadd.f32 %v4081_v7, %v3439_v10  ;;  %v4142_v40 = vpop.f32.mrb[55].mxu0  ;;  %v3458_v43 = vmax.f32 %v3437_v18, 0.0 }
 0x624   :  { %v3459_v58 = vmax.f32 %v3440_v16, 0.0 }
 0x626   :  { %v3463_v4 = vpack.c.bf16 %v3459_v58, %v3458_v43 }
 0x627   :  { %v3444_v3 = vpop.f32.mrb[56].mxu0 }
 0x628   :  { %v3445_v36 = vadd.f32 %v4081_v7, %v3444_v3  ;;  %v4145_v63 = vpop.f32.mrb[57].mxu0  ;;  %4164 = vmatmul.mubr.msk.bf16.vlgmr.msra.gmra.mrb[64].mxu0 %vm3517_vm13, %v3463_v4 }
 0x629   :  { %v3447_v38 = vpop.f32.mrb[58].mxu0 }
 0x62a   :  { %v3448_v62 = vadd.f32 %v4081_v7, %v3447_v38  ;;  %v4146_v27 = vpop.f32.mrb[59].mxu0  ;;  %v3460_v2 = vmax.f32 %v3445_v36, 0.0 }
 0x62c   :  { %v3461_v34 = vmax.f32 %v3448_v62, 0.0 }
 0x62e   :  { %v3464_v5 = vpack.c.bf16 %v3461_v34, %v3460_v2 }
 0x62f   :  { %v3452_v59 = vpop.f32.mrb[60].mxu0 }
 0x630   :  { %v3453_v61 = vadd.f32 %v4081_v7, %v3452_v59  ;;  %v4149_v32 = vpop.f32.mrb[61].mxu0  ;;  %4168 = vmatmul.mubr.msk.bf16.vlgmr.msra.gmra.mrb[56].mxu1 %vm3517_vm13, %v3464_v5 }
 0x631   :  { %v3455_v33 = vpop.f32.mrb[62].mxu0  ;;  %4171 = vmatprep.mubr.msk.bf16.mxu1 %vm4717_vm10, %v4716_v29 }
 0x632   :  { %v3462_v1 = vmax.f32 %v3453_v61, 0.0  ;;  %v4150_v9 = vpop.f32.mrb[63].mxu0 }
 0x634   :  { %v3465_v56 = vpack.c.bf16 %v3462_v1, %v3462_v1 }
 0x638   :  { %4172 = vmatmul.mubr.msk.bf16.gmra.mrb[60].mxu1 %vm3517_vm13, %v3465_v56 }
 0x6fb   :  { %v3565_v30 = vpop.f32.mrb[64].mxu0 }
 0x6fc   :  { %v3566_v42 = vadd.f32 %v4093_v41, %v3565_v30  ;;  %v4165_v11 = vpop.f32.mrb[65].mxu0 }
 0x6fd   :  { %v3568_v48 = vpop.f32.mrb[66].mxu0 }
 0x6fe   :  { %3585 = vst.msk [vmem:[#allocation2] sm:$0x1] %vm3584_vm14, %v3566_v42  ;;  %v4166_v52 = vpop.f32.mrb[67].mxu0 }
 0x703   :  { %v3572_v49 = vpop.f32.mrb[56].mxu1 }
 0x704   :  { %v4169_v47 = vpop.f32.mrb[57].mxu1 }
 0x705   :  { %v3574_v29 = vpop.f32.mrb[58].mxu1 }
 0x706   :  { %v4170_v19 = vpop.f32.mrb[59].mxu1 }
 0x70b   :  { %v3578_v39 = vpop.f32.mrb[60].mxu1 }
 0x70c   :  { %v3579_v14 = vadd.f32 %v4093_v41, %v3578_v39  ;;  %v4173_v20 = vpop.f32.mrb[61].mxu1 }
 0x70d   :  { %v3581_v54 = vpop.f32.mrb[62].mxu1 }
 0x70e   :  { %3586 = vst.msk [vmem:[#allocation2 + $0x1] sm:$0x1] %vm3584_vm14, %v3579_v14  ;;  %v4174_v35 = vpop.f32.mrb[63].mxu1 }
 0x70f   :  { %4700 = shalt.err (!%p4697_p4)
}
 0x710   :  { %s4701_s24 = scalar_lea.hbm %s6300_s11, 32 }
 0x711   :  { %p4702_p5 = scmp.ne.s32.totalorder %s6300_s11, %s4701_s24  ;;  %p4705_p6 = scmp.lt.u32.totalorder %s4701_s24, %s6300_s11 }
 0x713   :  { %p4707_p7 = pnand %p4705_p6, %p4702_p5 }
 0x715   :  { %4710 = shalt.err (!%p4707_p7)
}
 0x716   :  { %3596 = dma.vmem_to_hbm [thread:$0]  %s3594_s21, 32, %s6300_s11, [#allocation3]  }
 0x717   :  { %4711 = dma.done.wait [#allocation3], 32  }
 0x718   :  { %4712 = vsyncadd [#allocation3], 4294967264 }
 0x719   :  { %3600 = vsyncpa [#allocation3], 1 }

</bundles_post_ra>
